<compile_context>
chip_gen: v7x
topology: tpu7x:2x2x1
jax: 0.10.0
libtpu: 0.0.40
codegen_flags: <defaults>
</compile_context>

<pallas_src>
import functools
import math

import numpy as np
import jax
import jax.numpy as jnp
from jax.experimental import pallas as pl
from jax.experimental.pallas import tpu as pltpu


# Flat halo pad on the lane (spatial) axis.  Must be >= W + 1; a multiple of
# 128 keeps the interior writes lane-aligned full-width stores.
PAD = 128

_VMEM_SPEC = pl.BlockSpec(memory_space=pltpu.MemorySpace.VMEM)


# ----------------------------------------------------------------------------
# In-kernel helpers
# ----------------------------------------------------------------------------
def _im2col_bf16(x, masks, *, H, W, M, pad):
    """(Cin, pad+M+pad) flat activation -> (9*Cin, M) bf16 im2col matrix.

    Tap (dy, dx) of output position m lives at flat position m + dy*W + dx.
    Taps whose true 2-D target falls outside the image are zeroed by `masks`,
    which realizes the 1-pixel zero padding without any padded NHWC copy.
    """
    taps = []
    t = 0
    for dy in (-1, 0, 1):
        for dx in (-1, 0, 1):
            off = dy * W + dx
            s = x[:, pad + off: pad + off + M]            # (Cin, M) lane slice
            taps.append(s * masks[t:t + 1, :])
            t += 1
    return jnp.concatenate(taps, axis=0).astype(jnp.bfloat16)    # (9*Cin, M)


def _store_flat(o_ref, interior, *, M, pad):
    """Write `interior` (C, M) into the flat-padded (C, pad+M+pad) output ref."""
    z = jnp.zeros((o_ref.shape[0], pad), jnp.float32)
    o_ref[:, :pad] = z
    o_ref[:, pad + M:] = z
    o_ref[:, pad:pad + M] = interior.astype(jnp.float32)


# ----------------------------------------------------------------------------
# Pallas kernels
# ----------------------------------------------------------------------------
def conv3x3_kernel(x_ref, m_ref, w_ref, b_ref, o_ref, *, H, W, M, pad,
                   in_add, out_add):
    """3x3 same-padding conv as a single bf16 im2col matmul (lane-dense output).

    x_ref: (Cin, pad+M+pad) f32    m_ref: (9, M) f32
    w_ref: (Cout, 9*Cin)   bf16    b_ref: (Cout, 1) f32
    o_ref: (Cout, pad+M+pad) f32
    """
    x = x_ref[...]
    if in_add != 0.0:
        x = x + in_add                                    # head: fold (x - mean)
    patches = _im2col_bf16(x, m_ref[...], H=H, W=W, M=M, pad=pad)
    y = jnp.dot(w_ref[...], patches, preferred_element_type=jnp.float32)
    y = y + b_ref[...]
    if out_add != 0.0:
        y = y + out_add                                   # tail: fold (+ mean)
    _store_flat(o_ref, y, M=M, pad=pad)


def block_kernel(x_ref, m_ref, w3_ref, b3_ref, g_ref, be_ref, w1_ref, b1_ref,
                 o_ref, *, H, W, M, pad, eps):
    """One fused RepSR Block (training mode):

        y  = [conv1_3x3 ; conv2_3x3](x)       merged -> single im2col matmul
        yb = BatchNorm(y)                     per-batch stats, biased variance
        o  = [conv1_1x1 | conv2_1x1](yb) + x  merged -> single matmul + residual
    """
    x = x_ref[...]                                                # (F, Mp) f32
    patches = _im2col_bf16(x, m_ref[...], H=H, W=W, M=M, pad=pad)
    y = jnp.dot(w3_ref[...], patches, preferred_element_type=jnp.float32)
    y = y + b3_ref[...]                                           # (2*Cmid, M)

    # Training-mode BatchNorm: per-channel batch statistics over N*H*W
    mean = jnp.mean(y, axis=1, keepdims=True)
    d = y - mean
    var = jnp.mean(d * d, axis=1, keepdims=True)                  # biased var
    y_bn = d * (g_ref[...] * jax.lax.rsqrt(var + eps)) + be_ref[...]

    out = jnp.dot(w1_ref[...], y_bn.astype(jnp.bfloat16),
                  preferred_element_type=jnp.float32)             # (F, M)
    out = out + b1_ref[...] + x[:, pad:pad + M]                   # residual add
    _store_flat(o_ref, out, M=M, pad=pad)


# ----------------------------------------------------------------------------
# pallas_call wrappers
# ----------------------------------------------------------------------------
def conv3x3_flat(xp, masks, w, b, *, H, W, in_add=0.0, out_add=0.0):
    Cout = w.shape[0]
    Mp = xp.shape[1]
    M = masks.shape[1]
    kern = functools.partial(conv3x3_kernel, H=H, W=W, M=M, pad=PAD,
                             in_add=float(in_add), out_add=float(out_add))
    return pl.pallas_call(
        kern,
        out_shape=jax.ShapeDtypeStruct((Cout, Mp), jnp.float32),
        in_specs=[_VMEM_SPEC] * 4,
        out_specs=_VMEM_SPEC,
    )(xp, masks, w, b)


def block_flat(xp, masks, blk, *, H, W, eps=1e-5):
    F, Mp = xp.shape
    M = masks.shape[1]
    kern = functools.partial(block_kernel, H=H, W=W, M=M, pad=PAD, eps=eps)
    return pl.pallas_call(
        kern,
        out_shape=jax.ShapeDtypeStruct((F, Mp), jnp.float32),
        in_specs=[_VMEM_SPEC] * 8,
        out_specs=_VMEM_SPEC,
        input_output_aliases={0: 0},   # block input buffer reused for output
    )(xp, masks, blk["w3"], blk["b3"], blk["gamma"], blk["beta"],
      blk["w1"], blk["b1"])


# ----------------------------------------------------------------------------
# Forward pass
# ----------------------------------------------------------------------------
def repsr_forward(x_nchw, kparams, *, image_mean, scale, H, W):
    assert PAD >= W + 1
    N, C = x_nchw.shape[0], x_nchw.shape[1]
    M = N * H * W
    Mp = M + 2 * PAD
    masks = kparams["masks"]

    # One-time, tiny XLA relayout: NCHW -> channel-major flat (C, M) + halo pad.
    xf = jnp.transpose(x_nchw, (1, 0, 2, 3)).reshape(C, M).astype(jnp.float32)
    xp = jnp.zeros((C, Mp), jnp.float32).at[:, PAD:PAD + M].set(xf)

    out = conv3x3_flat(xp, masks, kparams["head_w"], kparams["head_b"],
                       H=H, W=W, in_add=-image_mean)            # head conv
    for blk in kparams["blocks"]:
        out = block_flat(out, masks, blk, H=H, W=W)             # fused blocks
    t = conv3x3_flat(out, masks, kparams["tail_w"], kparams["tail_b"],
                     H=H, W=W, out_add=image_mean)              # tail conv

    # TODO(synk): at production sizes fold this pixel-shuffle rearrangement
    # into the tail kernel's output via strided stores; here it is one tiny
    # XLA reshape/transpose on ~32KB.
    r = scale
    Co = t.shape[0]
    Cc = Co // (r * r)
    ti = t[:, PAD:PAD + M].reshape(Cc, r, r, N, H, W)
    return jnp.transpose(ti, (3, 0, 4, 1, 5, 2)).reshape(N, Cc, H * r, W * r)


# ----------------------------------------------------------------------------
# Parameter construction (PyTorch layouts + init) and kernel-format packing
# ----------------------------------------------------------------------------
def make_params(key, num_channels, num_residual_units, num_blocks, scale):
    F = num_residual_units
    Cmid = 2 * F
    num_outputs = scale * scale * num_channels

    def kaiming(key, shape, fan):
        std = math.sqrt(2.0 / fan)
        return std * jax.random.normal(key, shape, jnp.float32)

    keys = jax.random.split(key, 2 + 4 * num_blocks)
    ki = iter(keys)

    params = {}
    params["head_w"] = kaiming(next(ki), (F, num_channels, 3, 3),
                               num_channels * 9)                 # fan_in
    params["head_b"] = jnp.zeros((F,), jnp.float32)

    blocks = []
    for _ in range(num_blocks):
        blk = {
            "c1_3_w": kaiming(next(ki), (Cmid, F, 3, 3), Cmid * 9),  # fan_out
            "c1_3_b": jnp.zeros((Cmid,), jnp.float32),
            "c2_3_w": kaiming(next(ki), (Cmid, F, 3, 3), Cmid * 9),
            "c2_3_b": jnp.zeros((Cmid,), jnp.float32),
            "c1_1_w": kaiming(next(ki), (F, Cmid, 1, 1), F * 1),
            "c1_1_b": jnp.zeros((F,), jnp.float32),
            "c2_1_w": kaiming(next(ki), (F, Cmid, 1, 1), F * 1),
            "c2_1_b": jnp.zeros((F,), jnp.float32),
            "bn1_g": jnp.ones((Cmid,), jnp.float32),
            "bn1_b": jnp.zeros((Cmid,), jnp.float32),
            "bn2_g": jnp.ones((Cmid,), jnp.float32),
            "bn2_b": jnp.zeros((Cmid,), jnp.float32),
        }
        blocks.append(blk)
    params["blocks"] = blocks

    params["tail_w"] = kaiming(next(ki), (num_outputs, F, 3, 3),
                               num_outputs * 9)                  # fan_out
    params["tail_b"] = jnp.zeros((num_outputs,), jnp.float32)
    return params


def make_masks(N, H, W):
    """(9, N*H*W) validity masks for the 9 conv taps in the flat layout."""
    hw = np.arange(N * H * W) % (H * W)
    h, w = hw // W, hw % W
    rows = []
    for dy in (-1, 0, 1):
        for dx in (-1, 0, 1):
            ok = (h + dy >= 0) & (h + dy < H) & (w + dx >= 0) & (w + dx < W)
            rows.append(ok.astype(np.float32))
    return jnp.asarray(np.stack(rows))


def _pack_w3x3(w):
    """torch (Cout, Cin, 3, 3) -> (Cout, 9*Cin) bf16, tap-major / cin-minor."""
    Cout, Cin = w.shape[0], w.shape[1]
    return jnp.transpose(w, (0, 2, 3, 1)).reshape(Cout, 9 * Cin).astype(jnp.bfloat16)


def pack_params(p, N, H, W):
    kp = {"masks": make_masks(N, H, W)}
    kp["head_w"] = _pack_w3x3(p["head_w"])
    kp["head_b"] = p["head_b"].reshape(-1, 1).astype(jnp.float32)
    kp["tail_w"] = _pack_w3x3(p["tail_w"])
    kp["tail_b"] = p["tail_b"].reshape(-1, 1).astype(jnp.float32)
    blocks = []
    for b in p["blocks"]:
        w3 = _pack_w3x3(jnp.concatenate([b["c1_3_w"], b["c2_3_w"]], axis=0))
        b3 = jnp.concatenate([b["c1_3_b"], b["c2_3_b"]]).reshape(-1, 1)
        gamma = jnp.concatenate([b["bn1_g"], b["bn2_g"]]).reshape(-1, 1)
        beta = jnp.concatenate([b["bn1_b"], b["bn2_b"]]).reshape(-1, 1)
        w1 = jnp.concatenate([b["c1_1_w"][:, :, 0, 0],
                              b["c2_1_w"][:, :, 0, 0]], axis=1)   # (F, 2*Cmid)
        b1 = (b["c1_1_b"] + b["c2_1_b"]).reshape(-1, 1)
        blocks.append({
            "w3": w3, "b3": b3.astype(jnp.float32),
            "gamma": gamma.astype(jnp.float32), "beta": beta.astype(jnp.float32),
            "w1": w1.astype(jnp.bfloat16), "b1": b1.astype(jnp.float32),
        })
    kp["blocks"] = blocks
    return kp


# ----------------------------------------------------------------------------
# Pure-JAX reference (mirrors the PyTorch module) for a sanity check
# ----------------------------------------------------------------------------
def reference_forward(x_nchw, p, *, image_mean, scale, eps=1e-5):
    def conv(x, w, b, pad):
        w = w.astype(jnp.bfloat16).astype(jnp.float32)   # match kernel bf16 weights
        y = jax.lax.conv_general_dilated(
            x, w, window_strides=(1, 1), padding=((pad, pad), (pad, pad)),
            dimension_numbers=("NCHW", "OIHW", "NCHW"))
        return y + b[None, :, None, None]

    def bn_train(x, g, b):
        mean = jnp.mean(x, axis=(0, 2, 3), keepdims=True)
        var = jnp.mean((x - mean) ** 2, axis=(0, 2, 3), keepdims=True)
        return (x - mean) * jax.lax.rsqrt(var + eps) * g[None, :, None, None] \
            + b[None, :, None, None]

    x = x_nchw - image_mean
    out = conv(x, p["head_w"], p["head_b"], 1)
    for blk in p["blocks"]:
        y1 = bn_train(conv(out, blk["c1_3_w"], blk["c1_3_b"], 1),
                      blk["bn1_g"], blk["bn1_b"])
        y2 = bn_train(conv(out, blk["c2_3_w"], blk["c2_3_b"], 1),
                      blk["bn2_g"], blk["bn2_b"])
        out = conv(y1, blk["c1_1_w"], blk["c1_1_b"], 0) \
            + conv(y2, blk["c2_1_w"], blk["c2_1_b"], 0) + out
    out = conv(out, p["tail_w"], p["tail_b"], 1)
    N, Co, H, W = out.shape
    r = scale
    C = Co // (r * r)
    out = out.reshape(N, C, r, r, H, W).transpose(0, 1, 4, 2, 5, 3)
    return out.reshape(N, C, H * r, W * r) + image_mean


# ----------------------------------------------------------------------------
if __name__ == "__main__":
    # Small synthetic config matching the module: num_channels=4,
    # num_residual_units=8, num_blocks=2, scale=2, image_mean=0.5
    num_channels = 4
    num_residual_units = 8
    num_blocks = 2
    scale = 2
    image_mean = 0.5
    N, H, W = 2, 16, 16

    root = jax.random.PRNGKey(0)
    k_x, k_p = jax.random.split(root)
    x = jax.random.normal(k_x, (N, num_channels, H, W), jnp.float32)   # NCHW
    torch_params = make_params(k_p, num_channels, num_residual_units,
                               num_blocks, scale)
    kparams = pack_params(torch_params, N, H, W)

    fwd = jax.jit(functools.partial(repsr_forward, image_mean=image_mean,
                                    scale=scale, H=H, W=W))
    out = jax.block_until_ready(fwd(x, kparams))

    expected_shape = (N, num_channels, H * scale, W * scale)
    assert out.shape == expected_shape, (out.shape, expected_shape)
    assert jnp.all(jnp.isfinite(out))

    # Numerical sanity check against a pure-JAX/XLA reference of the module
    # (loose tolerance: kernel uses bf16 matmul operands with f32 accumulation).
    ref_fwd = jax.jit(functools.partial(reference_forward,
                                        image_mean=image_mean, scale=scale))
    ref = jax.block_until_ready(ref_fwd(x, torch_params))
    max_err = float(jnp.max(jnp.abs(out - ref)))
    assert max_err < 0.25, f"kernel/reference mismatch: {max_err}"

    print("KERNEL_OK")
</pallas_src>

<mosaic_0001>
module attributes {stable_mosaic.version = 11 : i64} {
  func.func @conv3x3_kernel(%arg0: memref<4x768xf32, #tpu.memory_space<vmem>>, %arg1: memref<9x512xf32, #tpu.memory_space<vmem>>, %arg2: memref<8x36xbf16, #tpu.memory_space<vmem>>, %arg3: memref<8x1xf32, #tpu.memory_space<vmem>>, %arg4: memref<8x768xf32, #tpu.memory_space<vmem>>) attributes {dimension_semantics = [], scalar_prefetch = 0 : i64, scratch_operands = 0 : i64, tpu.core_type = #tpu.core_type<tc>} {
    %c0 = arith.constant 0 : index
    %c0_0 = arith.constant 0 : index
    %0 = vector.load %arg0[%c0, %c0_0] : memref<4x768xf32, #tpu.memory_space<vmem>>, vector<4x768xf32>
    %cst = arith.constant -5.000000e-01 : f32
    %1 = vector.broadcast %cst : f32 to vector<4x768xf32>
    %2 = arith.addf %0, %1 : vector<4x768xf32>
    %c0_1 = arith.constant 0 : index
    %c0_2 = arith.constant 0 : index
    %3 = vector.load %arg1[%c0_1, %c0_2] : memref<9x512xf32, #tpu.memory_space<vmem>>, vector<9x512xf32>
    %4 = vector.extract_strided_slice %2 {offsets = [0, 111], sizes = [4, 512], strides = [1, 1]} : vector<4x768xf32> to vector<4x512xf32>
    %5 = vector.extract_strided_slice %3 {offsets = [0, 0], sizes = [1, 512], strides = [1, 1]} : vector<9x512xf32> to vector<1x512xf32>
    %6 = vector.broadcast %5 : vector<1x512xf32> to vector<4x512xf32>
    %7 = arith.mulf %4, %6 : vector<4x512xf32>
    %8 = vector.extract_strided_slice %2 {offsets = [0, 112], sizes = [4, 512], strides = [1, 1]} : vector<4x768xf32> to vector<4x512xf32>
    %9 = vector.extract_strided_slice %3 {offsets = [1, 0], sizes = [1, 512], strides = [1, 1]} : vector<9x512xf32> to vector<1x512xf32>
    %10 = vector.broadcast %9 : vector<1x512xf32> to vector<4x512xf32>
    %11 = arith.mulf %8, %10 : vector<4x512xf32>
    %12 = vector.extract_strided_slice %2 {offsets = [0, 113], sizes = [4, 512], strides = [1, 1]} : vector<4x768xf32> to vector<4x512xf32>
    %13 = vector.extract_strided_slice %3 {offsets = [2, 0], sizes = [1, 512], strides = [1, 1]} : vector<9x512xf32> to vector<1x512xf32>
    %14 = vector.broadcast %13 : vector<1x512xf32> to vector<4x512xf32>
    %15 = arith.mulf %12, %14 : vector<4x512xf32>
    %16 = vector.extract_strided_slice %2 {offsets = [0, 127], sizes = [4, 512], strides = [1, 1]} : vector<4x768xf32> to vector<4x512xf32>
    %17 = vector.extract_strided_slice %3 {offsets = [3, 0], sizes = [1, 512], strides = [1, 1]} : vector<9x512xf32> to vector<1x512xf32>
    %18 = vector.broadcast %17 : vector<1x512xf32> to vector<4x512xf32>
    %19 = arith.mulf %16, %18 : vector<4x512xf32>
    %20 = vector.extract_strided_slice %2 {offsets = [0, 128], sizes = [4, 512], strides = [1, 1]} : vector<4x768xf32> to vector<4x512xf32>
    %21 = vector.extract_strided_slice %3 {offsets = [4, 0], sizes = [1, 512], strides = [1, 1]} : vector<9x512xf32> to vector<1x512xf32>
    %22 = vector.broadcast %21 : vector<1x512xf32> to vector<4x512xf32>
    %23 = arith.mulf %20, %22 : vector<4x512xf32>
    %24 = vector.extract_strided_slice %2 {offsets = [0, 129], sizes = [4, 512], strides = [1, 1]} : vector<4x768xf32> to vector<4x512xf32>
    %25 = vector.extract_strided_slice %3 {offsets = [5, 0], sizes = [1, 512], strides = [1, 1]} : vector<9x512xf32> to vector<1x512xf32>
    %26 = vector.broadcast %25 : vector<1x512xf32> to vector<4x512xf32>
    %27 = arith.mulf %24, %26 : vector<4x512xf32>
    %28 = vector.extract_strided_slice %2 {offsets = [0, 143], sizes = [4, 512], strides = [1, 1]} : vector<4x768xf32> to vector<4x512xf32>
    %29 = vector.extract_strided_slice %3 {offsets = [6, 0], sizes = [1, 512], strides = [1, 1]} : vector<9x512xf32> to vector<1x512xf32>
    %30 = vector.broadcast %29 : vector<1x512xf32> to vector<4x512xf32>
    %31 = arith.mulf %28, %30 : vector<4x512xf32>
    %32 = vector.extract_strided_slice %2 {offsets = [0, 144], sizes = [4, 512], strides = [1, 1]} : vector<4x768xf32> to vector<4x512xf32>
    %33 = vector.extract_strided_slice %3 {offsets = [7, 0], sizes = [1, 512], strides = [1, 1]} : vector<9x512xf32> to vector<1x512xf32>
    %34 = vector.broadcast %33 : vector<1x512xf32> to vector<4x512xf32>
    %35 = arith.mulf %32, %34 : vector<4x512xf32>
    %36 = vector.extract_strided_slice %2 {offsets = [0, 145], sizes = [4, 512], strides = [1, 1]} : vector<4x768xf32> to vector<4x512xf32>
    %37 = vector.extract_strided_slice %3 {offsets = [8, 0], sizes = [1, 512], strides = [1, 1]} : vector<9x512xf32> to vector<1x512xf32>
    %38 = vector.broadcast %37 : vector<1x512xf32> to vector<4x512xf32>
    %39 = arith.mulf %36, %38 : vector<4x512xf32>
    %40 = tpu.concatenate %7, %11, %15, %19, %23, %27, %31, %35, %39 in 0 : vector<4x512xf32>, vector<4x512xf32>, vector<4x512xf32>, vector<4x512xf32>, vector<4x512xf32>, vector<4x512xf32>, vector<4x512xf32>, vector<4x512xf32>, vector<4x512xf32> -> vector<36x512xf32>
    %41 = arith.truncf %40 : vector<36x512xf32> to vector<36x512xbf16>
    %c0_3 = arith.constant 0 : index
    %c0_4 = arith.constant 0 : index
    %42 = vector.load %arg2[%c0_3, %c0_4] : memref<8x36xbf16, #tpu.memory_space<vmem>>, vector<8x36xbf16>
    %cst_5 = arith.constant dense<0.000000e+00> : vector<8x512xf32>
    %43 = tpu.matmul %42, %41, %cst_5 {dimension_numbers = #tpu.dot_dimension_numbers<[1], [0], [0], [1], [0, 0, 1, 1], [], []>} : vector<8x36xbf16>, vector<36x512xbf16>, vector<8x512xf32> -> vector<8x512xf32>
    %c0_6 = arith.constant 0 : index
    %c0_7 = arith.constant 0 : index
    %44 = vector.load %arg3[%c0_6, %c0_7] : memref<8x1xf32, #tpu.memory_space<vmem>>, vector<8x1xf32>
    %45 = vector.broadcast %44 : vector<8x1xf32> to vector<8x512xf32>
    %46 = arith.addf %43, %45 : vector<8x512xf32>
    %cst_8 = arith.constant 0.000000e+00 : f32
    %47 = vector.broadcast %cst_8 : f32 to vector<8x128xf32>
    %c0_9 = arith.constant 0 : index
    %c0_10 = arith.constant 0 : index
    %48 = vector.load %arg4[%c0_9, %c0_10] : memref<8x768xf32, #tpu.memory_space<vmem>>, vector<8x128xf32>
    tpu.vector_store %arg4[%c0_9, %c0_10], %47 {strides = array<i32>} : memref<8x768xf32, #tpu.memory_space<vmem>>, vector<8x128xf32>,
    %c0_11 = arith.constant 0 : index
    %c640 = arith.constant 640 : index
    %49 = vector.load %arg4[%c0_11, %c640] : memref<8x768xf32, #tpu.memory_space<vmem>>, vector<8x128xf32>
    tpu.vector_store %arg4[%c0_11, %c640], %47 {strides = array<i32>} : memref<8x768xf32, #tpu.memory_space<vmem>>, vector<8x128xf32>,
    %c0_12 = arith.constant 0 : index
    %c128 = arith.constant 128 : index
    %50 = vector.load %arg4[%c0_12, %c128] : memref<8x768xf32, #tpu.memory_space<vmem>>, vector<8x512xf32>
    tpu.vector_store %arg4[%c0_12, %c128], %46 {strides = array<i32>} : memref<8x768xf32, #tpu.memory_space<vmem>>, vector<8x512xf32>,
    return
  }
}

module attributes {stable_mosaic.version = 11 : i64} {
  func.func @block_kernel(%arg0: memref<8x768xf32, #tpu.memory_space<vmem>>, %arg1: memref<9x512xf32, #tpu.memory_space<vmem>>, %arg2: memref<32x72xbf16, #tpu.memory_space<vmem>>, %arg3: memref<32x1xf32, #tpu.memory_space<vmem>>, %arg4: memref<32x1xf32, #tpu.memory_space<vmem>>, %arg5: memref<32x1xf32, #tpu.memory_space<vmem>>, %arg6: memref<8x32xbf16, #tpu.memory_space<vmem>>, %arg7: memref<8x1xf32, #tpu.memory_space<vmem>>, %arg8: memref<8x768xf32, #tpu.memory_space<vmem>>) attributes {dimension_semantics = [], scalar_prefetch = 0 : i64, scratch_operands = 0 : i64, tpu.core_type = #tpu.core_type<tc>} {
    %c0 = arith.constant 0 : index
    %c0_0 = arith.constant 0 : index
    %0 = vector.load %arg0[%c0, %c0_0] : memref<8x768xf32, #tpu.memory_space<vmem>>, vector<8x768xf32>
    %c0_1 = arith.constant 0 : index
    %c0_2 = arith.constant 0 : index
    %1 = vector.load %arg1[%c0_1, %c0_2] : memref<9x512xf32, #tpu.memory_space<vmem>>, vector<9x512xf32>
    %2 = vector.extract_strided_slice %0 {offsets = [0, 111], sizes = [8, 512], strides = [1, 1]} : vector<8x768xf32> to vector<8x512xf32>
    %3 = vector.extract_strided_slice %1 {offsets = [0, 0], sizes = [1, 512], strides = [1, 1]} : vector<9x512xf32> to vector<1x512xf32>
    %4 = vector.broadcast %3 : vector<1x512xf32> to vector<8x512xf32>
    %5 = arith.mulf %2, %4 : vector<8x512xf32>
    %6 = vector.extract_strided_slice %0 {offsets = [0, 112], sizes = [8, 512], strides = [1, 1]} : vector<8x768xf32> to vector<8x512xf32>
    %7 = vector.extract_strided_slice %1 {offsets = [1, 0], sizes = [1, 512], strides = [1, 1]} : vector<9x512xf32> to vector<1x512xf32>
    %8 = vector.broadcast %7 : vector<1x512xf32> to vector<8x512xf32>
    %9 = arith.mulf %6, %8 : vector<8x512xf32>
    %10 = vector.extract_strided_slice %0 {offsets = [0, 113], sizes = [8, 512], strides = [1, 1]} : vector<8x768xf32> to vector<8x512xf32>
    %11 = vector.extract_strided_slice %1 {offsets = [2, 0], sizes = [1, 512], strides = [1, 1]} : vector<9x512xf32> to vector<1x512xf32>
    %12 = vector.broadcast %11 : vector<1x512xf32> to vector<8x512xf32>
    %13 = arith.mulf %10, %12 : vector<8x512xf32>
    %14 = vector.extract_strided_slice %0 {offsets = [0, 127], sizes = [8, 512], strides = [1, 1]} : vector<8x768xf32> to vector<8x512xf32>
    %15 = vector.extract_strided_slice %1 {offsets = [3, 0], sizes = [1, 512], strides = [1, 1]} : vector<9x512xf32> to vector<1x512xf32>
    %16 = vector.broadcast %15 : vector<1x512xf32> to vector<8x512xf32>
    %17 = arith.mulf %14, %16 : vector<8x512xf32>
    %18 = vector.extract_strided_slice %0 {offsets = [0, 128], sizes = [8, 512], strides = [1, 1]} : vector<8x768xf32> to vector<8x512xf32>
    %19 = vector.extract_strided_slice %1 {offsets = [4, 0], sizes = [1, 512], strides = [1, 1]} : vector<9x512xf32> to vector<1x512xf32>
    %20 = vector.broadcast %19 : vector<1x512xf32> to vector<8x512xf32>
    %21 = arith.mulf %18, %20 : vector<8x512xf32>
    %22 = vector.extract_strided_slice %0 {offsets = [0, 129], sizes = [8, 512], strides = [1, 1]} : vector<8x768xf32> to vector<8x512xf32>
    %23 = vector.extract_strided_slice %1 {offsets = [5, 0], sizes = [1, 512], strides = [1, 1]} : vector<9x512xf32> to vector<1x512xf32>
    %24 = vector.broadcast %23 : vector<1x512xf32> to vector<8x512xf32>
    %25 = arith.mulf %22, %24 : vector<8x512xf32>
    %26 = vector.extract_strided_slice %0 {offsets = [0, 143], sizes = [8, 512], strides = [1, 1]} : vector<8x768xf32> to vector<8x512xf32>
    %27 = vector.extract_strided_slice %1 {offsets = [6, 0], sizes = [1, 512], strides = [1, 1]} : vector<9x512xf32> to vector<1x512xf32>
    %28 = vector.broadcast %27 : vector<1x512xf32> to vector<8x512xf32>
    %29 = arith.mulf %26, %28 : vector<8x512xf32>
    %30 = vector.extract_strided_slice %0 {offsets = [0, 144], sizes = [8, 512], strides = [1, 1]} : vector<8x768xf32> to vector<8x512xf32>
    %31 = vector.extract_strided_slice %1 {offsets = [7, 0], sizes = [1, 512], strides = [1, 1]} : vector<9x512xf32> to vector<1x512xf32>
    %32 = vector.broadcast %31 : vector<1x512xf32> to vector<8x512xf32>
    %33 = arith.mulf %30, %32 : vector<8x512xf32>
    %34 = vector.extract_strided_slice %0 {offsets = [0, 145], sizes = [8, 512], strides = [1, 1]} : vector<8x768xf32> to vector<8x512xf32>
    %35 = vector.extract_strided_slice %1 {offsets = [8, 0], sizes = [1, 512], strides = [1, 1]} : vector<9x512xf32> to vector<1x512xf32>
    %36 = vector.broadcast %35 : vector<1x512xf32> to vector<8x512xf32>
    %37 = arith.mulf %34, %36 : vector<8x512xf32>
    %38 = tpu.concatenate %5, %9, %13, %17, %21, %25, %29, %33, %37 in 0 : vector<8x512xf32>, vector<8x512xf32>, vector<8x512xf32>, vector<8x512xf32>, vector<8x512xf32>, vector<8x512xf32>, vector<8x512xf32>, vector<8x512xf32>, vector<8x512xf32> -> vector<72x512xf32>
    %39 = arith.truncf %38 : vector<72x512xf32> to vector<72x512xbf16>
    %c0_3 = arith.constant 0 : index
    %c0_4 = arith.constant 0 : index
    %40 = vector.load %arg2[%c0_3, %c0_4] : memref<32x72xbf16, #tpu.memory_space<vmem>>, vector<32x72xbf16>
    %cst = arith.constant dense<0.000000e+00> : vector<32x512xf32>
    %41 = tpu.matmul %40, %39, %cst {dimension_numbers = #tpu.dot_dimension_numbers<[1], [0], [0], [1], [0, 0, 1, 1], [], []>} : vector<32x72xbf16>, vector<72x512xbf16>, vector<32x512xf32> -> vector<32x512xf32>
    %c0_5 = arith.constant 0 : index
    %c0_6 = arith.constant 0 : index
    %42 = vector.load %arg3[%c0_5, %c0_6] : memref<32x1xf32, #tpu.memory_space<vmem>>, vector<32x1xf32>
    %43 = vector.broadcast %42 : vector<32x1xf32> to vector<32x512xf32>
    %44 = arith.addf %41, %43 : vector<32x512xf32>
    %cst_7 = arith.constant dense<0.000000e+00> : vector<32xf32>
    %45 = vector.multi_reduction <add>, %44, %cst_7 [1] : vector<32x512xf32> to vector<32xf32>
    %46 = vector.shape_cast %45 : vector<32xf32> to vector<32x1xf32>
    %cst_8 = arith.constant 5.120000e+02 : f32
    %47 = vector.broadcast %cst_8 : f32 to vector<32x1xf32>
    %48 = arith.divf %46, %47 : vector<32x1xf32>
    %49 = vector.broadcast %48 : vector<32x1xf32> to vector<32x512xf32>
    %50 = arith.subf %44, %49 : vector<32x512xf32>
    %51 = arith.mulf %50, %50 : vector<32x512xf32>
    %cst_9 = arith.constant dense<0.000000e+00> : vector<32xf32>
    %52 = vector.multi_reduction <add>, %51, %cst_9 [1] : vector<32x512xf32> to vector<32xf32>
    %53 = vector.shape_cast %52 : vector<32xf32> to vector<32x1xf32>
    %cst_10 = arith.constant 5.120000e+02 : f32
    %54 = vector.broadcast %cst_10 : f32 to vector<32x1xf32>
    %55 = arith.divf %53, %54 : vector<32x1xf32>
    %c0_11 = arith.constant 0 : index
    %c0_12 = arith.constant 0 : index
    %56 = vector.load %arg4[%c0_11, %c0_12] : memref<32x1xf32, #tpu.memory_space<vmem>>, vector<32x1xf32>
    %cst_13 = arith.constant 9.99999974E-6 : f32
    %57 = vector.broadcast %cst_13 : f32 to vector<32x1xf32>
    %58 = arith.addf %55, %57 : vector<32x1xf32>
    %59 = math.rsqrt %58 : vector<32x1xf32>
    %60 = arith.mulf %56, %59 : vector<32x1xf32>
    %61 = vector.broadcast %60 : vector<32x1xf32> to vector<32x512xf32>
    %62 = arith.mulf %50, %61 : vector<32x512xf32>
    %c0_14 = arith.constant 0 : index
    %c0_15 = arith.constant 0 : index
    %63 = vector.load %arg5[%c0_14, %c0_15] : memref<32x1xf32, #tpu.memory_space<vmem>>, vector<32x1xf32>
    %64 = vector.broadcast %63 : vector<32x1xf32> to vector<32x512xf32>
    %65 = arith.addf %62, %64 : vector<32x512xf32>
    %c0_16 = arith.constant 0 : index
    %c0_17 = arith.constant 0 : index
    %66 = vector.load %arg6[%c0_16, %c0_17] : memref<8x32xbf16, #tpu.memory_space<vmem>>, vector<8x32xbf16>
    %67 = arith.truncf %65 : vector<32x512xf32> to vector<32x512xbf16>
    %cst_18 = arith.constant dense<0.000000e+00> : vector<8x512xf32>
    %68 = tpu.matmul %66, %67, %cst_18 {dimension_numbers = #tpu.dot_dimension_numbers<[1], [0], [0], [1], [0, 0, 1, 1], [], []>} : vector<8x32xbf16>, vector<32x512xbf16>, vector<8x512xf32> -> vector<8x512xf32>
    %c0_19 = arith.constant 0 : index
    %c0_20 = arith.constant 0 : index
    %69 = vector.load %arg7[%c0_19, %c0_20] : memref<8x1xf32, #tpu.memory_space<vmem>>, vector<8x1xf32>
    %70 = vector.broadcast %69 : vector<8x1xf32> to vector<8x512xf32>
    %71 = arith.addf %68, %70 : vector<8x512xf32>
    %72 = vector.extract_strided_slice %0 {offsets = [0, 128], sizes = [8, 512], strides = [1, 1]} : vector<8x768xf32> to vector<8x512xf32>
    %73 = arith.addf %71, %72 : vector<8x512xf32>
    %cst_21 = arith.constant 0.000000e+00 : f32
    %74 = vector.broadcast %cst_21 : f32 to vector<8x128xf32>
    %c0_22 = arith.constant 0 : index
    %c0_23 = arith.constant 0 : index
    %75 = vector.load %arg8[%c0_22, %c0_23] : memref<8x768xf32, #tpu.memory_space<vmem>>, vector<8x128xf32>
    tpu.vector_store %arg8[%c0_22, %c0_23], %74 {strides = array<i32>} : memref<8x768xf32, #tpu.memory_space<vmem>>, vector<8x128xf32>,
    %c0_24 = arith.constant 0 : index
    %c640 = arith.constant 640 : index
    %76 = vector.load %arg8[%c0_24, %c640] : memref<8x768xf32, #tpu.memory_space<vmem>>, vector<8x128xf32>
    tpu.vector_store %arg8[%c0_24, %c640], %74 {strides = array<i32>} : memref<8x768xf32, #tpu.memory_space<vmem>>, vector<8x128xf32>,
    %c0_25 = arith.constant 0 : index
    %c128 = arith.constant 128 : index
    %77 = vector.load %arg8[%c0_25, %c128] : memref<8x768xf32, #tpu.memory_space<vmem>>, vector<8x512xf32>
    tpu.vector_store %arg8[%c0_25, %c128], %73 {strides = array<i32>} : memref<8x768xf32, #tpu.memory_space<vmem>>, vector<8x512xf32>,
    return
  }
}

module attributes {stable_mosaic.version = 11 : i64} {
  func.func @conv3x3_kernel(%arg0: memref<8x768xf32, #tpu.memory_space<vmem>>, %arg1: memref<9x512xf32, #tpu.memory_space<vmem>>, %arg2: memref<16x72xbf16, #tpu.memory_space<vmem>>, %arg3: memref<16x1xf32, #tpu.memory_space<vmem>>, %arg4: memref<16x768xf32, #tpu.memory_space<vmem>>) attributes {dimension_semantics = [], scalar_prefetch = 0 : i64, scratch_operands = 0 : i64, tpu.core_type = #tpu.core_type<tc>} {
    %c0 = arith.constant 0 : index
    %c0_0 = arith.constant 0 : index
    %0 = vector.load %arg0[%c0, %c0_0] : memref<8x768xf32, #tpu.memory_space<vmem>>, vector<8x768xf32>
    %c0_1 = arith.constant 0 : index
    %c0_2 = arith.constant 0 : index
    %1 = vector.load %arg1[%c0_1, %c0_2] : memref<9x512xf32, #tpu.memory_space<vmem>>, vector<9x512xf32>
    %2 = vector.extract_strided_slice %0 {offsets = [0, 111], sizes = [8, 512], strides = [1, 1]} : vector<8x768xf32> to vector<8x512xf32>
    %3 = vector.extract_strided_slice %1 {offsets = [0, 0], sizes = [1, 512], strides = [1, 1]} : vector<9x512xf32> to vector<1x512xf32>
    %4 = vector.broadcast %3 : vector<1x512xf32> to vector<8x512xf32>
    %5 = arith.mulf %2, %4 : vector<8x512xf32>
    %6 = vector.extract_strided_slice %0 {offsets = [0, 112], sizes = [8, 512], strides = [1, 1]} : vector<8x768xf32> to vector<8x512xf32>
    %7 = vector.extract_strided_slice %1 {offsets = [1, 0], sizes = [1, 512], strides = [1, 1]} : vector<9x512xf32> to vector<1x512xf32>
    %8 = vector.broadcast %7 : vector<1x512xf32> to vector<8x512xf32>
    %9 = arith.mulf %6, %8 : vector<8x512xf32>
    %10 = vector.extract_strided_slice %0 {offsets = [0, 113], sizes = [8, 512], strides = [1, 1]} : vector<8x768xf32> to vector<8x512xf32>
    %11 = vector.extract_strided_slice %1 {offsets = [2, 0], sizes = [1, 512], strides = [1, 1]} : vector<9x512xf32> to vector<1x512xf32>
    %12 = vector.broadcast %11 : vector<1x512xf32> to vector<8x512xf32>
    %13 = arith.mulf %10, %12 : vector<8x512xf32>
    %14 = vector.extract_strided_slice %0 {offsets = [0, 127], sizes = [8, 512], strides = [1, 1]} : vector<8x768xf32> to vector<8x512xf32>
    %15 = vector.extract_strided_slice %1 {offsets = [3, 0], sizes = [1, 512], strides = [1, 1]} : vector<9x512xf32> to vector<1x512xf32>
    %16 = vector.broadcast %15 : vector<1x512xf32> to vector<8x512xf32>
    %17 = arith.mulf %14, %16 : vector<8x512xf32>
    %18 = vector.extract_strided_slice %0 {offsets = [0, 128], sizes = [8, 512], strides = [1, 1]} : vector<8x768xf32> to vector<8x512xf32>
    %19 = vector.extract_strided_slice %1 {offsets = [4, 0], sizes = [1, 512], strides = [1, 1]} : vector<9x512xf32> to vector<1x512xf32>
    %20 = vector.broadcast %19 : vector<1x512xf32> to vector<8x512xf32>
    %21 = arith.mulf %18, %20 : vector<8x512xf32>
    %22 = vector.extract_strided_slice %0 {offsets = [0, 129], sizes = [8, 512], strides = [1, 1]} : vector<8x768xf32> to vector<8x512xf32>
    %23 = vector.extract_strided_slice %1 {offsets = [5, 0], sizes = [1, 512], strides = [1, 1]} : vector<9x512xf32> to vector<1x512xf32>
    %24 = vector.broadcast %23 : vector<1x512xf32> to vector<8x512xf32>
    %25 = arith.mulf %22, %24 : vector<8x512xf32>
    %26 = vector.extract_strided_slice %0 {offsets = [0, 143], sizes = [8, 512], strides = [1, 1]} : vector<8x768xf32> to vector<8x512xf32>
    %27 = vector.extract_strided_slice %1 {offsets = [6, 0], sizes = [1, 512], strides = [1, 1]} : vector<9x512xf32> to vector<1x512xf32>
    %28 = vector.broadcast %27 : vector<1x512xf32> to vector<8x512xf32>
    %29 = arith.mulf %26, %28 : vector<8x512xf32>
    %30 = vector.extract_strided_slice %0 {offsets = [0, 144], sizes = [8, 512], strides = [1, 1]} : vector<8x768xf32> to vector<8x512xf32>
    %31 = vector.extract_strided_slice %1 {offsets = [7, 0], sizes = [1, 512], strides = [1, 1]} : vector<9x512xf32> to vector<1x512xf32>
    %32 = vector.broadcast %31 : vector<1x512xf32> to vector<8x512xf32>
    %33 = arith.mulf %30, %32 : vector<8x512xf32>
    %34 = vector.extract_strided_slice %0 {offsets = [0, 145], sizes = [8, 512], strides = [1, 1]} : vector<8x768xf32> to vector<8x512xf32>
    %35 = vector.extract_strided_slice %1 {offsets = [8, 0], sizes = [1, 512], strides = [1, 1]} : vector<9x512xf32> to vector<1x512xf32>
    %36 = vector.broadcast %35 : vector<1x512xf32> to vector<8x512xf32>
    %37 = arith.mulf %34, %36 : vector<8x512xf32>
    %38 = tpu.concatenate %5, %9, %13, %17, %21, %25, %29, %33, %37 in 0 : vector<8x512xf32>, vector<8x512xf32>, vector<8x512xf32>, vector<8x512xf32>, vector<8x512xf32>, vector<8x512xf32>, vector<8x512xf32>, vector<8x512xf32>, vector<8x512xf32> -> vector<72x512xf32>
    %39 = arith.truncf %38 : vector<72x512xf32> to vector<72x512xbf16>
    %c0_3 = arith.constant 0 : index
    %c0_4 = arith.constant 0 : index
    %40 = vector.load %arg2[%c0_3, %c0_4] : memref<16x72xbf16, #tpu.memory_space<vmem>>, vector<16x72xbf16>
    %cst = arith.constant dense<0.000000e+00> : vector<16x512xf32>
    %41 = tpu.matmul %40, %39, %cst {dimension_numbers = #tpu.dot_dimension_numbers<[1], [0], [0], [1], [0, 0, 1, 1], [], []>} : vector<16x72xbf16>, vector<72x512xbf16>, vector<16x512xf32> -> vector<16x512xf32>
    %c0_5 = arith.constant 0 : index
    %c0_6 = arith.constant 0 : index
    %42 = vector.load %arg3[%c0_5, %c0_6] : memref<16x1xf32, #tpu.memory_space<vmem>>, vector<16x1xf32>
    %43 = vector.broadcast %42 : vector<16x1xf32> to vector<16x512xf32>
    %44 = arith.addf %41, %43 : vector<16x512xf32>
    %cst_7 = arith.constant 5.000000e-01 : f32
    %45 = vector.broadcast %cst_7 : f32 to vector<16x512xf32>
    %46 = arith.addf %44, %45 : vector<16x512xf32>
    %cst_8 = arith.constant 0.000000e+00 : f32
    %47 = vector.broadcast %cst_8 : f32 to vector<16x128xf32>
    %c0_9 = arith.constant 0 : index
    %c0_10 = arith.constant 0 : index
    %48 = vector.load %arg4[%c0_9, %c0_10] : memref<16x768xf32, #tpu.memory_space<vmem>>, vector<16x128xf32>
    tpu.vector_store %arg4[%c0_9, %c0_10], %47 {strides = array<i32>} : memref<16x768xf32, #tpu.memory_space<vmem>>, vector<16x128xf32>,
    %c0_11 = arith.constant 0 : index
    %c640 = arith.constant 640 : index
    %49 = vector.load %arg4[%c0_11, %c640] : memref<16x768xf32, #tpu.memory_space<vmem>>, vector<16x128xf32>
    tpu.vector_store %arg4[%c0_11, %c640], %47 {strides = array<i32>} : memref<16x768xf32, #tpu.memory_space<vmem>>, vector<16x128xf32>,
    %c0_12 = arith.constant 0 : index
    %c128 = arith.constant 128 : index
    %50 = vector.load %arg4[%c0_12, %c128] : memref<16x768xf32, #tpu.memory_space<vmem>>, vector<16x512xf32>
    tpu.vector_store %arg4[%c0_12, %c128], %46 {strides = array<i32>} : memref<16x768xf32, #tpu.memory_space<vmem>>, vector<16x512xf32>,
    return
  }
}

</mosaic_0001>

<bundles_post_ra>
// kernel: repsr_forward.4
= control target key start
LH: loop header
LB: loop body
LE: loop exit
PB: predicated region body
PF: predicated region fallthrough
CT: control target
= control target key end

     0   :  { %v32_v0 = vlaneseq  ;;  %s880_s23 = smov 113   ;;  %s881_s24 = smov 112   ;;  %vm62_vm0 = vcmask 1043456   ;;  %vm175_vm1 = vcmask 1039360   ;;  %vm137_vm2 = vcmask 924672   ;;  %s1293_s1 = inlined_call_operand.vmem [shape: f32[9,512], index: 1, kind: input, shape index: {}]   ;;  %s1294_s0 = inlined_call_operand.vmem [shape: f32[4,768], index: 0, kind: input, shape index: {}]   ;;  %s1295_s3 = inlined_call_operand.vmem [shape: f32[8,1], index: 3, kind: input, shape index: {}]   ;;  %s1296_s2 = inlined_call_operand.vmem [shape: bf16[8,36], index: 2, kind: input, shape index: {}]   ;;  %s1297_s4 = inlined_call_operand.vmem [shape: f32[8,768], index: 4, kind: output, shape index: {}]  }
   0x1   :  { %v918_v2 = vld [vmem:[%s1293_s1] sm:$0xff]  ;;  %v923_v3 = vld [vmem:[%s1293_s1 + $0x8] sm:$0xff]  ;;  %v930_v6 = vld [vmem:[%s1293_s1 + $0x10] sm:$0xff]  ;;  %s882_s29 = smov 127   ;;  %vm99_vm3 = vcmask 916480   ;;  %s884_s6 = smov 126  }
   0x2   :  { %v913_v1 = vshrl.u32 %v32_v0, 7  ;;  %v935_v7 = vld [vmem:[%s1293_s1 + $0x18] sm:$0xff]  ;;  %v19_v30 = vld [vmem:[%s1294_s0 + $0x8] sm:$0xff]  ;;  %v18_v31 = vld [vmem:[%s1294_s0] sm:$0xff]  ;;  %vm60_vm4 = vcmask 908288   ;;  %vm431_vm5 = vcmask 1031168  }
   0x3   :  { %v970_v36 = vadd.f32 -0.5, %v19_v30  ;;  %v972_v37 = vadd.f32 -0.5, %v18_v31  ;;  %v20_v40 = vld [vmem:[%s1294_s0 + $0x10] sm:$0xff]  ;;  %s883_s0 = smov 111   ;;  %vm653_vm6 = vcmask 138240   ;;  %vm678_vm7 = vcmask 1041408  }
   0x4   :  { %v111_v4 = vsub.s32 2, %v913_v1  ;;  %v73_v5 = vsub.s32 1, %v913_v1  ;;  %v149_v8 = vsub.s32 3, %v913_v1  ;;  %v223_v25 = vsub.s32 5, %v913_v1 }
   0x5   :  { %v264_v34 = vsub.s32 6, %v913_v1  ;;  %v991_v46 = vadd.f32 -0.5, %v20_v40  ;;  %v187_v47 = vsub.s32 4, %v913_v1  ;;  %v305_v48 = vsub.s32 7, %v913_v1 }
   0x6   :  { %v112_v9 = vrot.slane %v918_v2, %v111_v4  ;;  %v116_v10 = vrot.slane %v923_v3, %v111_v4  ;;  %v74_v11 = vrot.slane %v918_v2, %v73_v5  ;;  %v78_v12 = vrot.slane %v923_v3, %v73_v5 }
   0x7   :  { %v120_v13 = vrot.slane %v930_v6, %v111_v4  ;;  %v124_v14 = vrot.slane %v935_v7, %v111_v4  ;;  %v82_v15 = vrot.slane %v930_v6, %v73_v5  ;;  %v86_v16 = vrot.slane %v935_v7, %v73_v5 }
   0x8   :  { %v129_v17 = vcombine.low %v112_v9, %v116_v10  ;;  %v91_v18 = vcombine.low %v74_v11, %v78_v12  ;;  %v158_v20 = vrot.slane %v930_v6, %v149_v8  ;;  %v162_v21 = vrot.slane %v935_v7, %v149_v8 }
   0x9   :  { %v130_v19 = vcombine.low %v120_v13, %v124_v14  ;;  %v92_v22 = vcombine.low %v82_v15, %v86_v16  ;;  %v150_v23 = vrot.slane %v918_v2, %v149_v8  ;;  %v154_v24 = vrot.slane %v923_v3, %v149_v8 }
   0xa   :  { %131 = vrot.lane.b32.xlu1 %v129_v17, %s880_s23  ;;  %93 = vrot.lane.b32.xlu0 %v91_v18, %s881_s24  ;;  %v232_v26 = vrot.slane %v930_v6, %v223_v25  ;;  %v236_v27 = vrot.slane %v935_v7, %v223_v25  ;;  %v168_v28 = vcombine.low %v158_v20, %v162_v21  ;;  %v204_v55 = vrot.slane %v972_v37, 4 }
   0xb   :  { %v167_v29 = vcombine.low %v150_v23, %v154_v24  ;;  %v224_v33 = vrot.slane %v918_v2, %v223_v25  ;;  %v228_v35 = vrot.slane %v923_v3, %v223_v25  ;;  %v265_v38 = vrot.slane %v918_v2, %v264_v34 }
   0xc   :  { %v963_v32 = vcombine.low %v232_v26, %v236_v27  ;;  %v269_v39 = vrot.slane %v923_v3, %v264_v34  ;;  %v273_v42 = vrot.slane %v930_v6, %v264_v34  ;;  %v277_v43 = vrot.slane %v935_v7, %v264_v34 }
   0xd   :  { %v979_v41 = vcombine.low %v224_v33, %v228_v35  ;;  %v188_v49 = vrot.slane %v918_v2, %v187_v47  ;;  %v306_v50 = vrot.slane %v918_v2, %v305_v48  ;;  %v310_v51 = vrot.slane %v923_v3, %v305_v48 }
   0xe   :  { %133 = vrot.lane.b32.xlu1 %v130_v19, %s880_s23  ;;  %95 = vrot.lane.b32.xlu0 %v92_v22, %s881_s24  ;;  %v983_v44 = vcombine.low %v265_v38, %v269_v39  ;;  %v985_v45 = vcombine.low %v273_v42, %v277_v43  ;;  %v314_v52 = vrot.slane %v930_v6, %v305_v48  ;;  %v205_v58 = vrot.slane %v970_v36, 4 }
   0xf   :  { %v318_v53 = vrot.slane %v935_v7, %v305_v48  ;;  %v192_v54 = vrot.slane %v923_v3, %v187_v47  ;;  %v196_v56 = vrot.slane %v930_v6, %v187_v47  ;;  %v200_v57 = vrot.slane %v935_v7, %v187_v47 }
  0x10   :  { %v206_v59 = vrot.slane %v991_v46, 4  ;;  %v1014_v60 = vcombine.low %v306_v50, %v310_v51  ;;  %v34_v62 = vsub.s32 0, %v913_v1  ;;  %v207_v4 = vsel %vm62_vm0, %v204_v55, %v205_v58 }
  0x11   :  { %v1016_v61 = vcombine.low %v314_v52, %v318_v53  ;;  %v215_v63 = vcombine.low %v188_v49, %v192_v54  ;;  %v216_v0 = vcombine.low %v196_v56, %v200_v57  ;;  %vm674_vm8 = vcmask 293888  }
  0x12   :  { %171 = vrot.lane.b32.xlu1 %v168_v28, %s882_s29  ;;  %169 = vrot.lane.b32.xlu0 %v167_v29, %s882_s29  ;;  %v208_v5 = vsel %vm62_vm0, %v205_v58, %v206_v59  ;;  %v43_v8 = vrot.slane %v930_v6, %v34_v62  ;;  %v47_v9 = vrot.slane %v935_v7, %v34_v62 }
  0x13   :  { %v35_v10 = vrot.slane %v918_v2, %v34_v62  ;;  %v39_v1 = vrot.slane %v923_v3, %v34_v62  ;;  %v219_v11 = vmul.f32 %v215_v63, %v207_v4  ;;  %v220_v12 = vmul.f32 %v216_v0, %v208_v5 }
  0x14   :  { %v53_v13 = vcombine.low %v43_v8, %v47_v9 }
  0x15   :  { %v52_v6 = vcombine.low %v35_v10, %v39_v1  ;;  %v468_v2 = vcombine.high %v219_v11, %v219_v11  ;;  %v469_v7 = vcombine.high %v220_v12, %v220_v12 }
  0x16   :  { %239 = vrot.lane.b32.xlu1 %v970_v36, %s882_s29  ;;  %237 = vrot.lane.b32.xlu0 %v972_v37, %s882_s29 }
  0x17   :  { %v799_v14 = vpack.i.bf16 %v468_v2, %v219_v11  ;;  %v804_v15 = vpack.i.bf16 %v469_v7, %v220_v12 }
  0x1a   :  { %278 = vrot.lane.b32.xlu1 %v972_v37, %s880_s23  ;;  %241 = vrot.lane.b32.xlu0 %v991_v46, %s882_s29 }
  0x1e   :  { %282 = vrot.lane.b32.xlu1 %v991_v46, %s880_s23  ;;  %280 = vrot.lane.b32.xlu0 %v970_v36, %s880_s23 }
  0x22   :  { %319 = vrot.lane.b32.xlu0 %v972_v37, %s881_s24  ;;  %321 = vrot.lane.b32.xlu1 %v970_v36, %s881_s24 }
  0x26   :  { %323 = vrot.lane.b32.xlu0 %v991_v46, %s881_s24  ;;  %360 = vrot.lane.b32.xlu1 %v972_v37, %s883_s0 }
  0x2a   :  { %362 = vrot.lane.b32.xlu0 %v970_v36, %s883_s0  ;;  %364 = vrot.lane.b32.xlu1 %v991_v46, %s883_s0 }
  0x2e   :  { %56 = vrot.lane.b32.xlu1 %v53_v13, %s883_s0  ;;  %54 = vrot.lane.b32.xlu0 %v52_v6, %s883_s0 }
  0x32   :  { %800 = vrot.lane.b32.xlu1 %v799_v14, %s883_s0  ;;  %805 = vrot.lane.b32.xlu0 %v804_v15, %s883_s0 }
  0x7c   :  { %v132_v3 = vpop.permute.xlu1 %131  ;;  %v94_v16 = vpop.permute.xlu0 %93 }
  0x7d   :  { %v135_v31 = vrot.slane %v132_v3, 4  ;;  %v97_v55 = vrot.slane %v94_v16, 4 }
  0x7f   :  { %v138_v50 = vsel %vm137_vm2, %v135_v31, %v132_v3 }
  0x80   :  { %v1041_v17 = vpop.permute.xlu1 %133  ;;  %v96_v18 = vpop.permute.xlu0 %95  ;;  %v144_v0 = vmul.f32 %v138_v50, %v972_v37 }
  0x81   :  { %v136_v33 = vrot.slane %v1041_v17, 4 }
  0x82   :  { %v419_v14 = vcombine.high %v144_v0, %v144_v0 }
  0x83   :  { %v139_v51 = vsel %vm62_vm0, %v135_v31, %v136_v33  ;;  %v146_v50 = vmul.f32 %v136_v33, %v991_v46 }
  0x84   :  { %v1043_v19 = vpop.permute.xlu1 %171  ;;  %v1045_v20 = vpop.permute.xlu0 %169  ;;  %v140_v4 = vsel %vm137_vm2, %v139_v51, %v1041_v17 }
  0x85   :  { %v174_v8 = vrot.slane %v1043_v19, 4  ;;  %v173_v9 = vrot.slane %v1045_v20, 4 }
  0x87   :  { %v177_v15 = vsel %vm62_vm0, %v173_v9, %v174_v8 }
  0x88   :  { %v240_v21 = vpop.permute.xlu1 %239  ;;  %v238_v22 = vpop.permute.xlu0 %237 }
  0x89   :  { %v244_v23 = vrot.slane %v240_v21, 4  ;;  %v243_v24 = vrot.slane %v238_v22, 4 }
  0x8b   :  { %v246_v25 = vsel %vm62_vm0, %v243_v24, %v244_v23 }
  0x8c   :  { %v279_v26 = vpop.permute.xlu1 %278  ;;  %v242_v27 = vpop.permute.xlu0 %241  ;;  %v247_v28 = vsel %vm175_vm1, %v246_v25, %v240_v21  ;;  %v184_v25 = vmul.f32 %v174_v8, %v991_v46 }
  0x8d   :  { %v245_v29 = vrot.slane %v242_v27, 4  ;;  %v260_v30 = vmul.f32 %v979_v41, %v247_v28  ;;  %v284_v34 = vrot.slane %v279_v26, 4  ;;  %v98_v41 = vrot.slane %v96_v18, 4 }
  0x8f   :  { %v248_v35 = vsel %vm62_vm0, %v244_v23, %v245_v29  ;;  %v488_v38 = vcombine.low %v260_v30, %v260_v30  ;;  %v101_v5 = vsel %vm62_vm0, %v97_v55, %v98_v41  ;;  %v108_v12 = vmul.f32 %v98_v41, %v991_v46 }
  0x90   :  { %v249_v39 = vsel %vm175_vm1, %v248_v35, %v242_v27  ;;  %v283_v40 = vpop.permute.xlu1 %282  ;;  %v281_v42 = vpop.permute.xlu0 %280  ;;  %v102_v2 = vsel %vm99_vm3, %v101_v5, %v96_v18  ;;  %v176_v18 = vsel %vm175_vm1, %v173_v9, %v1045_v20  ;;  %v178_v27 = vsel %vm175_vm1, %v177_v15, %v1043_v19  ;;  %v783_v20 = vld [vmem:[%s1293_s1 + $0x20] ss:$0 sm:$0xff]  ;;  %v784_v19 = vld [vmem:[%s1293_s1 + $0x28] ss:$0 sm:$0xff] }
  0x91   :  { %v261_v43 = vmul.f32 %v963_v32, %v249_v39  ;;  %v286_v47 = vrot.slane %v283_v40, 4  ;;  %v285_v48 = vrot.slane %v281_v42, 4  ;;  %v809_v49 = vpack.i.bf16 %v260_v30, %v488_v38 }
  0x92   :  { %v107_v23 = vmul.f32 %v102_v2, %v970_v36  ;;  %v396_v24 = vcombine.low %v108_v12, %v108_v12  ;;  %v446_v38 = vcombine.low %v184_v25, %v184_v25  ;;  %v182_v39 = vmul.f32 %v176_v18, %v972_v37 }
  0x93   :  { %v489_v52 = vcombine.low %v261_v43, %v261_v43  ;;  %v287_v53 = vsel %vm62_vm0, %v284_v34, %v285_v48  ;;  %v289_v54 = vsel %vm62_vm0, %v285_v48, %v286_v47  ;;  %810 = vrot.lane.b32.xlu1 %v809_v49, %s883_s0  ;;  %v379_v51 = vcombine.low %v783_v20, %v784_v19 }
  0x94   :  { %v288_v32 = vsel %vm137_vm2, %v287_v53, %v281_v42  ;;  %v290_v56 = vsel %vm137_vm2, %v289_v54, %v283_v40  ;;  %v320_v57 = vpop.permute.xlu0 %319  ;;  %v322_v58 = vpop.permute.xlu1 %321  ;;  %v829_v40 = vpack.i.bf16 %v396_v24, %v107_v23  ;;  %v183_v42 = vmul.f32 %v178_v27, %v970_v36  ;;  %v785_v54 = vld [vmem:[%s1293_s1 + $0x30] ss:$0 sm:$0xff] }
  0x95   :  { %v301_v59 = vmul.f32 %v983_v44, %v288_v32  ;;  %v814_v62 = vpack.i.bf16 %v261_v43, %v489_v52  ;;  %v302_v63 = vmul.f32 %v985_v45, %v290_v56  ;;  %v100_v44 = vsel %vm99_vm3, %v97_v55, %v94_v16  ;;  %v786_v55 = vld [vmem:[%s1293_s1 + $0x38] ss:$0 sm:$0xff]  ;;  %s885_s1 = smov 17  }
  0x96   :  { %v145_v45 = vmul.f32 %v140_v4, %v970_v36  ;;  %v325_v3 = vrot.slane %v320_v57, 4  ;;  %v326_v21 = vrot.slane %v322_v58, 4  ;;  %v106_v16 = vmul.f32 %v100_v44, %v972_v37 }
  0x97   :  { %v508_v10 = vcombine.high %v301_v59, %v301_v59  ;;  %815 = vrot.lane.b32.xlu0 %v814_v62, %s883_s0  ;;  %v509_v1 = vcombine.high %v302_v63, %v302_v63  ;;  %v395_v52 = vcombine.low %v107_v23, %v107_v23  ;;  %v834_v32 = vpack.i.bf16 %v446_v38, %v183_v42 }
  0x98   :  { %v324_v11 = vpop.permute.xlu0 %323  ;;  %v361_v7 = vpop.permute.xlu1 %360  ;;  %v839_v26 = vpack.i.bf16 %v145_v45, %v419_v14  ;;  %v328_v28 = vsel %vm62_vm0, %v325_v3, %v326_v21  ;;  %v394_v34 = vcombine.low %v106_v16, %v106_v16  ;;  %v420_v41 = vcombine.high %v145_v45, %v145_v45 }
  0x99   :  { %v824_v13 = vpack.i.bf16 %v509_v1, %v302_v63  ;;  %v819_v6 = vpack.i.bf16 %v508_v10, %v301_v59  ;;  %v327_v29 = vrot.slane %v324_v11, 4  ;;  %v366_v30 = vrot.slane %v361_v7, 4 }
  0x9a   :  { %v329_v43 = vsel %vm99_vm3, %v328_v28, %v322_v58  ;;  %v444_v56 = vcombine.low %v182_v39, %v182_v39  ;;  %v849_v58 = vpack.i.bf16 %v146_v50, %v420_v41  ;;  %v445_v59 = vcombine.low %v183_v42, %v183_v42 }
  0x9b   :  { %825 = vrot.lane.b32.xlu0 %v824_v13, %s883_s0  ;;  %820 = vrot.lane.b32.xlu1 %v819_v6, %s883_s0  ;;  %v330_v47 = vsel %vm62_vm0, %v326_v21, %v327_v29  ;;  %v342_v53 = vmul.f32 %v1014_v60, %v329_v43  ;;  %v380_v60 = vcombine.low %v785_v54, %v786_v55 }
  0x9c   :  { %v363_v22 = vpop.permute.xlu0 %362  ;;  %v365_v35 = vpop.permute.xlu1 %364  ;;  %v331_v57 = vsel %vm99_vm3, %v330_v47, %v324_v11  ;;  %v844_v4 = vpack.i.bf16 %v395_v52, %v106_v16  ;;  %v859_v8 = vpack.i.bf16 %v445_v59, %v182_v39 }
  0x9d   :  { %v367_v31 = vrot.slane %v363_v22, 4  ;;  %v368_v49 = vrot.slane %v365_v35, 4  ;;  %v528_v62 = vcombine.low %v342_v53, %v342_v53  ;;  %v343_v63 = vmul.f32 %v1016_v61, %v331_v57 }
  0x9f   :  { %421 = vrot.lane.b32.xlu1 %v144_v0, %s884_s6  ;;  %840 = vrot.lane.b32.xlu0 %v839_v26, %s884_s6  ;;  %v369_v48 = vsel %vm62_vm0, %v366_v30, %v367_v31  ;;  %v371_v33 = vsel %vm62_vm0, %v367_v31, %v368_v49  ;;  %v529_v9 = vcombine.low %v343_v63, %v343_v63 }
  0xa0   :  { %v370_v17 = vsel %vm60_vm4, %v369_v48, %v363_v22  ;;  %v372_v5 = vsel %vm60_vm4, %v371_v33, %v365_v35  ;;  %v854_v44 = vpack.i.bf16 %v342_v53, %v528_v62  ;;  %v57_v13 = vpop.permute.xlu1 %56  ;;  %v55_v6 = vpop.permute.xlu0 %54 }
  0xa1   :  { %v383_v0 = vmul.f32 %v379_v51, %v370_v17  ;;  %v384_v1 = vmul.f32 %v380_v60, %v372_v5  ;;  %v864_v61 = vpack.i.bf16 %v343_v63, %v529_v9  ;;  %v59_v18 = vrot.slane %v57_v13, 4 }
  0xa2   :  { %v58_v27 = vrot.slane %v55_v6, 4 }
  0xa3   :  { %830 = vrot.lane.b32.xlu1 %v829_v40, %s882_s29  ;;  %397 = vrot.lane.b32.xlu0 %v394_v34, %s882_s29  ;;  %v548_v10 = vcombine.high %v383_v0, %v383_v0  ;;  %v549_v11 = vcombine.high %v384_v1, %v384_v1  ;;  %v1150_v19 = vmul.f32 %v59_v18, %v991_v46 }
  0xa4   :  { %v801_v2 = vpop.permute.xlu1 %800  ;;  %v1126_v7 = vpop.permute.xlu0 %805  ;;  %v63_v30 = vsel %vm62_vm0, %v58_v27, %v59_v18  ;;  %v1153_v43 = vsel %vm60_vm4, %v58_v27, %v55_v6 }
  0xa5   :  { %v869_v45 = vpack.i.bf16 %v548_v10, %v383_v0  ;;  %v874_v12 = vpack.i.bf16 %v549_v11, %v384_v1  ;;  %v803_v31 = vunpack.i.h.bf16 %v801_v2  ;;  %v802_v34 = vunpack.i.l.bf16 %v801_v2 }
  0xa6   :  { %v1156_v47 = vsel %vm60_vm4, %v63_v30, %v57_v13  ;;  %v808_v41 = vunpack.i.h.bf16 %v1126_v7  ;;  %v807_v51 = vunpack.i.l.bf16 %v1126_v7 }
  0xa7   :  { %835 = vrot.lane.b32.xlu1 %v834_v32, %s881_s24  ;;  %447 = vrot.lane.b32.xlu0 %v444_v56, %s881_s24  ;;  %v478_v50 = vsel %vm60_vm4, %v802_v34, %v803_v31 }
  0xa8   :  { %v479_v0 = vsel %vm60_vm4, %v803_v31, %v807_v51 }
  0xab   :  { %850 = vrot.lane.b32.xlu1 %v849_v58, %s884_s6  ;;  %845 = vrot.lane.b32.xlu0 %v844_v4, %s882_s29  ;;  %v480_v4 = vsel %vm60_vm4, %v807_v51, %v808_v41 }
  0xaf   :  { %855 = vrot.lane.b32.xlu1 %v854_v44, %s883_s0  ;;  %860 = vrot.lane.b32.xlu0 %v859_v8, %s881_s24 }
  0xb3   :  { %870 = vrot.lane.b32.xlu1 %v869_v45, %s883_s0  ;;  %865 = vrot.lane.b32.xlu0 %v864_v61, %s883_s0 }
  0xb7   :  { %875 = vrot.lane.b32.xlu0 %v874_v12, %s883_s0 }
 0x105   :  { %v811_v14 = vpop.permute.xlu1 %810 }
 0x106   :  { %v813_v35 = vunpack.i.h.bf16 %v811_v14  ;;  %v812_v38 = vunpack.i.l.bf16 %v811_v14 }
 0x108   :  { %v498_v52 = vsel %vm60_vm4, %v812_v38, %v813_v35  ;;  %v576_v32 = vsel %vm62_vm0, %v802_v34, %v812_v38 }
 0x109   :  { %v816_v15 = vpop.permute.xlu0 %815  ;;  %v577_v1 = vsel %vm62_vm0, %v478_v50, %v498_v52 }
 0x10a   :  { %v817_v46 = vunpack.i.l.bf16 %v816_v15  ;;  %v818_v57 = vunpack.i.h.bf16 %v816_v15 }
 0x10c   :  { %v499_v9 = vsel %vm60_vm4, %v813_v35, %v817_v46  ;;  %v500_v11 = vsel %vm60_vm4, %v817_v46, %v818_v57  ;;  %v580_v12 = vsel %vm62_vm0, %v808_v41, %v818_v57 }
 0x10d   :  { %v1128_v3 = vpop.permute.xlu0 %825  ;;  %v821_v21 = vpop.permute.xlu1 %820  ;;  %v579_v27 = vsel %vm62_vm0, %v480_v4, %v500_v11  ;;  %v578_v30 = vsel %vm62_vm0, %v479_v0, %v499_v9  ;;  %v886_v9 = vmov 0  }
 0x10e   :  { %v823_v48 = vunpack.i.h.bf16 %v821_v21  ;;  %v822_v49 = vunpack.i.l.bf16 %v821_v21  ;;  %v828_v58 = vunpack.i.h.bf16 %v1128_v3  ;;  %v827_v59 = vunpack.i.l.bf16 %v1128_v3  ;;  %723 = vmatprep.mubr.bf16.mxu0 %v886_v9  ;;  %764 = vmatprep.mubr.bf16.mxu1 %v886_v9 }
 0x10f   :  { %879 = vset.pattern.permute.xlu0 %v886_v9 }
 0x110   :  { %v518_v62 = vsel %vm60_vm4, %v822_v49, %v823_v48  ;;  %v520_v13 = vsel %vm60_vm4, %v827_v59, %v828_v58  ;;  %v519_v6 = vsel %vm60_vm4, %v823_v48, %v827_v59 }
 0x111   :  { %v1130_v16 = vpop.permute.xlu1 %421  ;;  %v1132_v22 = vpop.permute.xlu0 %840 }
 0x112   :  { %v842_v2 = vunpack.i.l.bf16 %v1132_v22  ;;  %v843_v34 = vunpack.i.h.bf16 %v1132_v22 }
 0x115   :  { %v1134_v23 = vpop.permute.xlu1 %830  ;;  %v1136_v24 = vpop.permute.xlu0 %397 }
 0x116   :  { %v833_v35 = vunpack.i.h.bf16 %v1134_v23  ;;  %v832_v51 = vunpack.i.l.bf16 %v1134_v23 }
 0x119   :  { %v1138_v25 = vpop.permute.xlu1 %835  ;;  %v1140_v26 = vpop.permute.xlu0 %447 }
 0x11a   :  { %v838_v38 = vunpack.i.h.bf16 %v1138_v25 }
 0x11d   :  { %v1142_v28 = vpop.permute.xlu1 %850  ;;  %v1144_v29 = vpop.permute.xlu0 %845 }
 0x11e   :  { %v853_v14 = vunpack.i.h.bf16 %v1142_v28  ;;  %v847_v15 = vunpack.i.l.bf16 %v1144_v29 }
 0x120   :  { %v407_v22 = vsel %vm175_vm1, %v1136_v24, %v847_v15  ;;  %v575_v41 = vsel %vm62_vm0, %v853_v14, %v838_v38  ;;  %v570_v24 = vsel %vm62_vm0, %v1150_v19, %v833_v35 }
 0x121   :  { %v856_v39 = vpop.permute.xlu1 %855  ;;  %v1147_v20 = vpop.permute.xlu0 %860  ;;  %v590_v52 = vpack.c.bf16 %v575_v41, %v570_v24 }
 0x122   :  { %v858_v40 = vunpack.i.h.bf16 %v856_v39  ;;  %v857_v42 = vunpack.i.l.bf16 %v856_v39  ;;  %v862_v45 = vunpack.i.l.bf16 %v1147_v20  ;;  %v863_v18 = vunpack.i.h.bf16 %v1147_v20 }
 0x123   :  { %v837_v20 = vunpack.i.l.bf16 %v1138_v25 }
 0x124   :  { %v538_v53 = vsel %vm60_vm4, %v857_v42, %v858_v40  ;;  %v581_v56 = vsel %vm62_vm0, %v822_v49, %v857_v42  ;;  %v457_v39 = vsel %vm99_vm3, %v1140_v26, %v862_v45  ;;  %v848_v42 = vunpack.i.h.bf16 %v1144_v29 }
 0x125   :  { %v1163_v54 = vpop.permute.xlu1 %870  ;;  %v866_v55 = vpop.permute.xlu0 %865  ;;  %v591_v63 = vpack.c.bf16 %v581_v56, %v576_v32  ;;  %v582_v8 = vsel %vm62_vm0, %v518_v62, %v538_v53  ;;  %v432_v49 = vsel %vm431_vm5, %v1130_v16, %v842_v2  ;;  %v68_v26 = vmul.f32 %v1153_v43, %v972_v37 }
 0x126   :  { %v1168_v17 = vunpack.i.l.bf16 %v1163_v54  ;;  %v868_v33 = vunpack.i.h.bf16 %v866_v55  ;;  %v867_v60 = vunpack.i.l.bf16 %v866_v55  ;;  %v592_v7 = vpack.c.bf16 %v582_v8, %v577_v1 }
 0x127   :  { %633 = vrot.lane.b32.xlu0 %v591_v63, %s885_s1  ;;  %v459_v25 = vsel %vm99_vm3, %v863_v18, %v837_v20  ;;  %v433_v29 = vsel %vm431_vm5, %v842_v2, %v843_v34  ;;  %v458_v16 = vsel %vm99_vm3, %v862_v45, %v863_v18  ;;  %v69_v37 = vmul.f32 %v1156_v47, %v970_v36 }
 0x128   :  { %v596_v5 = vpack.c.bf16 %v1168_v17, %v1168_v17  ;;  %v540_v10 = vsel %vm60_vm4, %v867_v60, %v868_v33  ;;  %v585_v44 = vsel %vm62_vm0, %v828_v58, %v868_v33  ;;  %v539_v61 = vsel %vm60_vm4, %v858_v40, %v867_v60 }
 0x129   :  { %v595_v3 = vpack.c.bf16 %v585_v44, %v580_v12  ;;  %v584_v21 = vsel %vm62_vm0, %v520_v13, %v540_v10  ;;  %v583_v31 = vsel %vm62_vm0, %v519_v6, %v539_v61  ;;  %v852_v40 = vunpack.i.l.bf16 %v1142_v28  ;;  %v876_v33 = vpop.permute.xlu0 %875  ;;  %v602_v12 = vld [vmem:[%s1295_s3] sm:$0xff] }
 0x12a   :  { %643 = vrot.lane.b32.xlu1 %v596_v5, %s885_s1  ;;  %v594_v48 = vpack.c.bf16 %v584_v21, %v579_v27  ;;  %v593_v50 = vpack.c.bf16 %v583_v31, %v578_v30  ;;  %v571_v28 = vsel %vm62_vm0, %v432_v49, %v457_v39  ;;  %v409_v43 = vsel %vm175_vm1, %v848_v42, %v832_v51 }
 0x12b   :  { %635 = vrot.lane.b32.xlu0 %v592_v7, %s885_s1  ;;  %v434_v23 = vsel %vm431_vm5, %v843_v34, %v852_v40  ;;  %v566_v46 = vsel %vm62_vm0, %v68_v26, %v407_v22  ;;  %v408_v53 = vsel %vm175_vm1, %v847_v15, %v848_v42  ;;  %v873_v55 = vunpack.i.h.bf16 %v1163_v54 }
 0x12c   :  { %v586_v32 = vpack.c.bf16 %v571_v28, %v566_v46  ;;  %v573_v56 = vsel %vm62_vm0, %v434_v23, %v459_v25  ;;  %v387_v57 = vcombine.high %v68_v26, %v68_v26  ;;  %v572_v36 = vsel %vm62_vm0, %v433_v29, %v458_v16  ;;  %v601_v28 = vld [vmem:[%s1296_s2] sm:$0xf] }
 0x12d   :  { %v435_v19 = vsel %vm431_vm5, %v852_v40, %v853_v14  ;;  %v568_v47 = vsel %vm62_vm0, %v69_v37, %v409_v43  ;;  %v410_v60 = vsel %vm175_vm1, %v832_v51, %v833_v35  ;;  %v460_v58 = vsel %vm99_vm3, %v837_v20, %v838_v38 }
 0x12e   :  { %641 = vrot.lane.b32.xlu1 %v595_v3, %s885_s1  ;;  %v588_v54 = vpack.c.bf16 %v573_v56, %v568_v47  ;;  %v567_v59 = vsel %vm62_vm0, %v387_v57, %v408_v53  ;;  %v878_v62 = vunpack.i.h.bf16 %v876_v33  ;;  %v877_v63 = vunpack.i.l.bf16 %v876_v33 }
 0x12f   :  { %639 = vrot.lane.b32.xlu0 %v594_v48, %s885_s1  ;;  %v587_v0 = vpack.c.bf16 %v572_v36, %v567_v59  ;;  %v558_v4 = vsel %vm60_vm4, %v1168_v17, %v873_v55  ;;  %v388_v5 = vcombine.high %v69_v37, %v69_v37  ;;  %v574_v8 = vsel %vm62_vm0, %v435_v19, %v460_v58 }
 0x130   :  { %v597_v10 = vpack.c.bf16 %v558_v4, %v558_v4  ;;  %v560_v11 = vsel %vm60_vm4, %v877_v63, %v878_v62  ;;  %v559_v17 = vsel %vm60_vm4, %v873_v55, %v877_v63  ;;  %v600_v13 = vpack.c.bf16 %v878_v62, %v878_v62 }
 0x131   :  { %v569_v1 = vsel %vm62_vm0, %v388_v5, %v410_v60  ;;  %v599_v45 = vpack.c.bf16 %v560_v11, %v560_v11  ;;  %v598_v61 = vpack.c.bf16 %v559_v17, %v559_v17  ;;  %v887_v37 = vmov 0.0  }
 0x132   :  { %637 = vrot.lane.b32.xlu1 %v593_v50, %s885_s1  ;;  %v589_v44 = vpack.c.bf16 %v574_v8, %v569_v1  ;;  %773 = vst [vmem:[%s1297_s4] sm:$0xff] %v887_v37  ;;  %774 = vst [vmem:[%s1297_s4 + $0x28] sm:$0xff] %v887_v37 }
 0x133   :  { %631 = vrot.lane.b32.xlu0 %v590_v52, %s885_s1 }
 0x136   :  { %623 = vrot.lane.b32.xlu1 %v586_v32, %s885_s1 }
 0x137   :  { %627 = vrot.lane.b32.xlu0 %v588_v54, %s885_s1 }
 0x13a   :  { %625 = vrot.lane.b32.xlu1 %v587_v0, %s885_s1 }
 0x13b   :  { %645 = vrot.lane.b32.xlu0 %v597_v10, %s885_s1 }
 0x13e   :  { %629 = vrot.lane.b32.xlu1 %v589_v44, %s885_s1 }
 0x13f   :  { %649 = vrot.lane.b32.xlu0 %v599_v45, %s885_s1 }
 0x142   :  { %647 = vrot.lane.b32.xlu1 %v598_v61, %s885_s1 }
 0x143   :  { %605 = vperm.xlu0 %879, %v602_v12  }
 0x146   :  { %651 = vrot.lane.b32.xlu1 %v600_v13, %s885_s1 }
 0x199   :  { %v634_v6 = vpop.permute.xlu0 %633 }
 0x19c   :  { %v644_v2 = vpop.permute.xlu1 %643 }
 0x19d   :  { %v636_v7 = vpop.permute.xlu0 %635 }
 0x19e   :  { %v658_v42 = vsel %vm653_vm6, %v634_v6, %v636_v7 }
 0x1a0   :  { %v642_v14 = vpop.permute.xlu1 %641 }
 0x1a1   :  { %v640_v15 = vpop.permute.xlu0 %639 }
 0x1a2   :  { %v661_v49 = vsel %vm653_vm6, %v640_v15, %v642_v14 }
 0x1a4   :  { %v638_v3 = vpop.permute.xlu1 %637 }
 0x1a5   :  { %v632_v21 = vpop.permute.xlu0 %631  ;;  %v659_v35 = vsel %vm653_vm6, %v636_v7, %v638_v3  ;;  %v660_v51 = vsel %vm653_vm6, %v638_v3, %v640_v15 }
 0x1a8   :  { %v624_v18 = vpop.permute.xlu1 %623 }
 0x1a9   :  { %v628_v27 = vpop.permute.xlu0 %627 }
 0x1ac   :  { %v626_v30 = vpop.permute.xlu1 %625 }
 0x1ad   :  { %v655_v31 = vsel %vm653_vm6, %v626_v30, %v628_v27  ;;  %v654_v34 = vsel %vm653_vm6, %v624_v18, %v626_v30  ;;  %v646_v38 = vpop.permute.xlu0 %645 }
 0x1ae   :  { %691 = vmatprep.subr.bf16.mxu0 %v655_v31  ;;  %v662_v48 = vsel %vm653_vm6, %v644_v2, %v646_v38 }
 0x1af   :  { %692 = vmatpush1.bf16.msra.mxu0 %v654_v34  ;;  %v680_v26 = vsel %vm678_vm7, %v662_v48, 0 }
 0x1b0   :  { %693 = vmatprep.subr.bf16.mxu0 %v659_v35  ;;  %v630_v39 = vpop.permute.xlu1 %629 }
 0x1b1   :  { %v657_v20 = vsel %vm653_vm6, %v630_v39, %v632_v21  ;;  %v656_v40 = vsel %vm653_vm6, %v628_v27, %v630_v39  ;;  %v650_v41 = vpop.permute.xlu0 %649 }
 0x1b2   :  { %732 = vmatprep.subr.bf16.mxu1 %v657_v20 }
 0x1b3   :  { %694 = vmatpush1.bf16.msra.mxu0 %v658_v42  ;;  %733 = vmatpush1.bf16.msra.mxu1 %v656_v40 }
 0x1b4   :  { %734 = vmatprep.subr.bf16.mxu1 %v661_v49  ;;  %v648_v22 = vpop.permute.xlu1 %647 }
 0x1b5   :  { %v663_v50 = vsel %vm653_vm6, %v646_v38, %v648_v22  ;;  %v664_v25 = vsel %vm653_vm6, %v648_v22, %v650_v41 }
 0x1b6   :  { %787 = vmatprep.subr.msk.bf16.mxu0 %vm678_vm7, %v663_v50  ;;  %v686_v24 = vsel %vm678_vm7, %v664_v25, 0 }
 0x1b7   :  { %696 = vmatpush1.bf16.msra.mxu0 %v680_v26  ;;  %735 = vmatpush1.bf16.msra.mxu1 %v660_v51 }
 0x1b8   :  { %v652_v29 = vpop.permute.xlu1 %651 }
 0x1b9   :  { %v665_v16 = vsel %vm653_vm6, %v650_v41, %v652_v29 }
 0x1ba   :  { %789 = vmatprep.subr.msk.bf16.mxu1 %vm678_vm7, %v665_v16  ;;  %788 = vmatmul.mubr.msk.bf16.vlgmr.msra.gmra.mrb[0].mxu0 %vm674_vm8, %v601_v28 }
 0x1bb   :  { %737 = vmatpush1.bf16.msra.mxu1 %v686_v24 }
 0x1be   :  { %790 = vmatmul.mubr.msk.bf16.vlgmr.msra.gmra.mrb[0].mxu1 %vm674_vm8, %v601_v28 }
 0x1c2   :  { %v606_v23 = vpop.permute.xlu0 %605 }
 0x28d   :  { %v725_v43 = vpop.f32.mrb[0].mxu0 }
 0x28e   :  { %v727_v52 = vpop.f32.mrb[1].mxu0  ;;  %v726_v46 = vadd.f32 %v725_v43, %v606_v23 }
 0x28f   :  { %v729_v53 = vpop.f32.mrb[2].mxu0  ;;  %v728_v55 = vadd.f32 %v727_v52, %v606_v23 }
 0x290   :  { %775 = vst [vmem:[%s1297_s4 + $0x8] sm:$0xff] %v726_v46  ;;  %v730_v32 = vpop.f32.mrb[3].mxu0 }
 0x291   :  { %776 = vst [vmem:[%s1297_s4 + $0x10] sm:$0xff] %v728_v55  ;;  %v766_v56 = vpop.f32.mrb[0].mxu1 }
 0x292   :  { %v767_v57 = vadd.f32 %v766_v56, %v606_v23  ;;  %v768_v33 = vpop.f32.mrb[1].mxu1 }
 0x293   :  { %v769_v36 = vadd.f32 %v768_v33, %v606_v23  ;;  %v770_v19 = vpop.f32.mrb[2].mxu1 }
 0x294   :  { %777 = vst [vmem:[%s1297_s4 + $0x18] sm:$0xff] %v767_v57  ;;  %v771_v47 = vpop.f32.mrb[3].mxu1 }
 0x295   :  { %778 = vst [vmem:[%s1297_s4 + $0x20] sm:$0xff] %v769_v36 }

// kernel: repsr_forward.7
= control target key start
LH: loop header
LB: loop body
LE: loop exit
PB: predicated region body
PF: predicated region fallthrough
CT: control target
= control target key end

     0   :  { %v32_v0 = vlaneseq  ;;  %s971_s23 = smov 112   ;;  %s972_s24 = smov 113   ;;  %vm102_vm0 = vcmask 916480   ;;  %vm144_vm1 = vcmask 924672   ;;  %vm374_vm2 = vcmask 138240   ;;  %s1484_s1 = inlined_call_operand.vmem [shape: f32[9,512], index: 1, kind: input, shape index: {}]   ;;  %s1485_s0 = inlined_call_operand.vmem [shape: f32[8,768], index: 0, kind: input, shape index: {}]   ;;  %s1486_s2 = inlined_call_operand.vmem [shape: bf16[16,72], index: 2, kind: input, shape index: {}]   ;;  %s1487_s3 = inlined_call_operand.vmem [shape: f32[16,1], index: 3, kind: input, shape index: {}]   ;;  %s1488_s4 = inlined_call_operand.vmem [shape: f32[16,768], index: 4, kind: output, shape index: {}]  }
   0x1   :  { %v1016_v2 = vld [vmem:[%s1484_s1 + $0x10] sm:$0xff]  ;;  %v1021_v3 = vld [vmem:[%s1484_s1] sm:$0xff]  ;;  %v1027_v5 = vld [vmem:[%s1484_s1 + $0x18] sm:$0xff]  ;;  %s973_s25 = smov 127   ;;  %s974_s26 = smov 1   ;;  %vm186_vm3 = vcmask 1039360  }
   0x2   :  { %v1011_v1 = vshrl.u32 %v32_v0, 7  ;;  %v1032_v6 = vld [vmem:[%s1484_s1 + $0x8] sm:$0xff]  ;;  %s975_s27 = smov 15   ;;  %s976_s28 = smov 16   ;;  %v864_v37 = vld [vmem:[%s1484_s1 + $0x20] ss:$0 sm:$0xff] }
   0x3   :  { %v865_v36 = vld [vmem:[%s1484_s1 + $0x28] ss:$0 sm:$0xff]  ;;  %s977_s7 = smov 17   ;;  %v867_v40 = vld [vmem:[%s1484_s1 + $0x38] ss:$0 sm:$0xff]  ;;  %v1100_v46 = vld [vmem:[%s1485_s0 + $0x10] sm:$0xff] }
   0x4   :  { %v76_v4 = vsub.s32 1, %v1011_v1  ;;  %v118_v11 = vsub.s32 2, %v1011_v1  ;;  %v160_v16 = vsub.s32 3, %v1011_v1  ;;  %v222_v21 = vsub.s32 5, %v1011_v1  ;;  %v866_v41 = vld [vmem:[%s1484_s1 + $0x30] ss:$0 sm:$0xff] }
   0x5   :  { %v264_v26 = vsub.s32 6, %v1011_v1  ;;  %v306_v31 = vsub.s32 7, %v1011_v1  ;;  %v34_v38 = vsub.s32 0, %v1011_v1  ;;  %v202_v39 = vsub.s32 4, %v1011_v1  ;;  %v1095_v45 = vld [vmem:[%s1485_s0 + $0x8] sm:$0xff]  ;;  %v1109_v51 = vld [vmem:[%s1485_s0 + $0x18] sm:$0xff] }
   0x6   :  { %v85_v7 = vrot.slane %v1016_v2, %v76_v4  ;;  %v77_v8 = vrot.slane %v1021_v3, %v76_v4  ;;  %v89_v9 = vrot.slane %v1027_v5, %v76_v4  ;;  %v81_v10 = vrot.slane %v1032_v6, %v76_v4  ;;  %v1114_v52 = vld [vmem:[%s1485_s0 + $0x20] sm:$0xff]  ;;  %s978_s19 = smov 111   ;;  %s979_s22 = smov 126  }
   0x7   :  { %v123_v12 = vrot.slane %v1032_v6, %v118_v11  ;;  %v119_v13 = vrot.slane %v1021_v3, %v118_v11  ;;  %v131_v14 = vrot.slane %v1027_v5, %v118_v11  ;;  %v127_v15 = vrot.slane %v1016_v2, %v118_v11  ;;  %v1135_v4 = vld [vmem:[%s1485_s0] sm:$0xff]  ;;  %s983_s29 = smov 96  }
   0x8   :  { %98 = vrot.lane.b32.xlu1 %v85_v7, %s971_s23  ;;  %94 = vrot.lane.b32.xlu0 %v77_v8, %s971_s23  ;;  %v165_v17 = vrot.slane %v1032_v6, %v160_v16  ;;  %v161_v18 = vrot.slane %v1021_v3, %v160_v16  ;;  %v173_v19 = vrot.slane %v1027_v5, %v160_v16  ;;  %vm248_vm4 = vcmask 7168  }
   0x9   :  { %v169_v20 = vrot.slane %v1016_v2, %v160_v16  ;;  %v227_v22 = vrot.slane %v1032_v6, %v222_v21  ;;  %v223_v23 = vrot.slane %v1021_v3, %v222_v21  ;;  %v235_v24 = vrot.slane %v1027_v5, %v222_v21 }
   0xa   :  { %v231_v25 = vrot.slane %v1016_v2, %v222_v21  ;;  %v269_v27 = vrot.slane %v1032_v6, %v264_v26  ;;  %v265_v28 = vrot.slane %v1021_v3, %v264_v26  ;;  %v277_v29 = vrot.slane %v1027_v5, %v264_v26 }
   0xb   :  { %v273_v30 = vrot.slane %v1016_v2, %v264_v26  ;;  %v311_v32 = vrot.slane %v1032_v6, %v306_v31  ;;  %v307_v33 = vrot.slane %v1021_v3, %v306_v31  ;;  %v319_v34 = vrot.slane %v1027_v5, %v306_v31 }
   0xc   :  { %100 = vrot.lane.b32.xlu1 %v89_v9, %s971_s23  ;;  %96 = vrot.lane.b32.xlu0 %v81_v10, %s971_s23  ;;  %v315_v35 = vrot.slane %v1016_v2, %v306_v31  ;;  %v39_v42 = vrot.slane %v1032_v6, %v34_v38  ;;  %v203_v43 = vrot.slane %v1021_v3, %v202_v39  ;;  %vm290_vm5 = vcmask 121856  }
   0xd   :  { %v207_v44 = vrot.slane %v1032_v6, %v202_v39  ;;  %v35_v47 = vrot.slane %v1021_v3, %v34_v38  ;;  %v211_v48 = vrot.slane %v1016_v2, %v202_v39  ;;  %v215_v49 = vrot.slane %v1027_v5, %v202_v39 }
   0xe   :  { %v47_v50 = vrot.slane %v1027_v5, %v34_v38  ;;  %v216_v53 = vmul.f32 %v203_v43, %v1095_v45  ;;  %v43_v55 = vrot.slane %v1016_v2, %v34_v38  ;;  %vm332_vm6 = vcmask 130048  }
   0xf   :  { %v217_v54 = vmul.f32 %v207_v44, %v1100_v46  ;;  %v218_v56 = vmul.f32 %v211_v48, %v1109_v51  ;;  %v219_v57 = vmul.f32 %v215_v49, %v1114_v52  ;;  %vm571_vm7 = vcmask 769024  }
  0x10   :  { %138 = vrot.lane.b32.xlu1 %v123_v12, %s972_s24  ;;  %136 = vrot.lane.b32.xlu0 %v119_v13, %s972_s24  ;;  %vm60_vm8 = vcmask 908288   ;;  %vm427_vm9 = vcmask 1031168   ;;  %vm496_vm10 = vcmask 900096   ;;  %vm546_vm11 = vcmask 777216  }
  0x11   :  { %v888_v58 = vpack.i.bf16 %v217_v54, %v216_v53  ;;  %v893_v59 = vpack.i.bf16 %v219_v57, %v218_v56  ;;  %vm521_vm12 = vcmask 785408   ;;  %vm741_vm13 = vcmask 1043456  }
  0x12   :  { %vm737_vm14 = vcmask 588800  }
  0x14   :  { %142 = vrot.lane.b32.xlu1 %v131_v14, %s972_s24  ;;  %140 = vrot.lane.b32.xlu0 %v127_v15, %s972_s24 }
  0x18   :  { %180 = vrot.lane.b32.xlu1 %v165_v17, %s973_s25  ;;  %178 = vrot.lane.b32.xlu0 %v161_v18, %s973_s25  ;;  %v1154_v17 = vld [vmem:[%s1485_s0 + $0x28] sm:$0xff]  ;;  %s981_s0 = smov 95  }
  0x1c   :  { %184 = vrot.lane.b32.xlu1 %v173_v19, %s973_s25  ;;  %182 = vrot.lane.b32.xlu0 %v169_v20, %s973_s25 }
  0x20   :  { %242 = vrot.lane.b32.xlu1 %v227_v22, %s974_s26  ;;  %240 = vrot.lane.b32.xlu0 %v223_v23, %s974_s26 }
  0x24   :  { %246 = vrot.lane.b32.xlu1 %v235_v24, %s974_s26  ;;  %244 = vrot.lane.b32.xlu0 %v231_v25, %s974_s26 }
  0x28   :  { %284 = vrot.lane.b32.xlu1 %v269_v27, %s975_s27  ;;  %282 = vrot.lane.b32.xlu0 %v265_v28, %s975_s27 }
  0x2c   :  { %288 = vrot.lane.b32.xlu1 %v277_v29, %s975_s27  ;;  %286 = vrot.lane.b32.xlu0 %v273_v30, %s975_s27  ;;  %s980_s27 = smov 110  }
  0x30   :  { %326 = vrot.lane.b32.xlu1 %v311_v32, %s976_s28  ;;  %324 = vrot.lane.b32.xlu0 %v307_v33, %s976_s28 }
  0x34   :  { %330 = vrot.lane.b32.xlu1 %v319_v34, %s976_s28  ;;  %328 = vrot.lane.b32.xlu0 %v315_v35, %s976_s28  ;;  %s982_s28 = smov 94  }
  0x38   :  { %368 = vrot.lane.b32.xlu1 %v865_v36, %s977_s7  ;;  %366 = vrot.lane.b32.xlu0 %v864_v37, %s977_s7 }
  0x3c   :  { %372 = vrot.lane.b32.xlu1 %v867_v40, %s977_s7  ;;  %370 = vrot.lane.b32.xlu0 %v866_v41, %s977_s7 }
  0x40   :  { %54 = vrot.lane.b32.xlu1 %v39_v42, %s978_s19  ;;  %52 = vrot.lane.b32.xlu0 %v35_v47, %s978_s19 }
  0x44   :  { %58 = vrot.lane.b32.xlu1 %v47_v50, %s978_s19  ;;  %56 = vrot.lane.b32.xlu0 %v43_v55, %s978_s19 }
  0x48   :  { %889 = vrot.lane.b32.xlu1 %v888_v58, %s978_s19  ;;  %894 = vrot.lane.b32.xlu0 %v893_v59, %s978_s19 }
  0x7a   :  { %v99_v60 = vpop.permute.xlu1 %98  ;;  %v1121_v61 = vpop.permute.xlu0 %94 }
  0x7b   :  { %v111_v54 = vmul.f32 %v1121_v61, %v1135_v4 }
  0x7e   :  { %v101_v62 = vpop.permute.xlu1 %100  ;;  %v97_v63 = vpop.permute.xlu0 %96 }
  0x7f   :  { %v103_v0 = vsel %vm102_vm0, %v1121_v61, %v97_v63  ;;  %v104_v1 = vsel %vm102_vm0, %v97_v63, %v99_v60  ;;  %v105_v27 = vsel %vm102_vm0, %v99_v60, %v101_v62  ;;  %v115_v31 = vmul.f32 %v101_v62, %v1114_v52 }
  0x80   :  { %v1127_v2 = vmul.f32 %v103_v0, %v1095_v45  ;;  %v1130_v3 = vmul.f32 %v104_v1, %v1100_v46  ;;  %v114_v30 = vmul.f32 %v105_v27, %v1109_v51 }
  0x82   :  { %v139_v5 = vpop.permute.xlu1 %138  ;;  %v137_v6 = vpop.permute.xlu0 %136  ;;  %v903_v7 = vpack.i.bf16 %v1130_v3, %v1127_v2  ;;  %v908_v37 = vpack.i.bf16 %v115_v31, %v114_v30 }
  0x83   :  { %v153_v8 = vmul.f32 %v137_v6, %v1135_v4  ;;  %v145_v34 = vsel %vm144_vm1, %v137_v6, %v139_v5 }
  0x84   :  { %v154_v43 = vmul.f32 %v145_v34, %v1095_v45 }
  0x85   :  { %417 = vrot.lane.b32.xlu1 %v153_v8, %s979_s22 }
  0x86   :  { %v1141_v9 = vpop.permute.xlu1 %142  ;;  %v1143_v10 = vpop.permute.xlu0 %140 }
  0x87   :  { %v146_v33 = vsel %vm144_vm1, %v139_v5, %v1143_v10  ;;  %v147_v8 = vsel %vm144_vm1, %v1143_v10, %v1141_v9 }
  0x88   :  { %v155_v38 = vmul.f32 %v146_v33, %v1100_v46  ;;  %v156_v27 = vmul.f32 %v147_v8, %v1109_v51 }
  0x8a   :  { %v181_v11 = vpop.permute.xlu1 %180  ;;  %v179_v12 = vpop.permute.xlu0 %178  ;;  %v913_v49 = vpack.i.bf16 %v155_v38, %v154_v43 }
  0x8b   :  { %v187_v44 = vsel %vm186_vm3, %v179_v12, %v181_v11  ;;  %v195_v60 = vmul.f32 %v179_v12, %v1135_v4 }
  0x8c   :  { %v196_v53 = vmul.f32 %v187_v44, %v1095_v45 }
  0x8e   :  { %v1145_v13 = vpop.permute.xlu1 %184  ;;  %v1147_v14 = vpop.permute.xlu0 %182 }
  0x8f   :  { %v188_v41 = vsel %vm186_vm3, %v181_v11, %v1147_v14  ;;  %v189_v10 = vsel %vm186_vm3, %v1147_v14, %v1145_v13 }
  0x90   :  { %v197_v48 = vmul.f32 %v188_v41, %v1100_v46 }
  0x92   :  { %v1149_v15 = vpop.permute.xlu1 %242  ;;  %v241_v16 = vpop.permute.xlu0 %240  ;;  %v923_v57 = vpack.i.bf16 %v197_v48, %v196_v53 }
  0x93   :  { %v249_v50 = vsel %vm248_vm4, %v241_v16, %v1149_v15  ;;  %v257_v55 = vmul.f32 %v241_v16, %v1095_v45 }
  0x94   :  { %v258_v56 = vmul.f32 %v249_v50, %v1100_v46 }
  0x96   :  { %v1156_v18 = vpop.permute.xlu1 %246  ;;  %v1158_v19 = vpop.permute.xlu0 %244  ;;  %v933_v62 = vpack.i.bf16 %v258_v56, %v257_v55 }
  0x97   :  { %v261_v20 = vmul.f32 %v1156_v18, %v1154_v17  ;;  %v250_v14 = vsel %vm248_vm4, %v1149_v15, %v1158_v19  ;;  %v251_v34 = vsel %vm248_vm4, %v1158_v19, %v1156_v18 }
  0x98   :  { %v259_v2 = vmul.f32 %v250_v14, %v1109_v51  ;;  %v260_v3 = vmul.f32 %v251_v34, %v1114_v52 }
  0x99   :  { %494 = vrot.lane.b32.xlu1 %v261_v20, %s980_s27 }
  0x9a   :  { %v1163_v21 = vpop.permute.xlu1 %284  ;;  %v1165_v22 = vpop.permute.xlu0 %282  ;;  %v938_v19 = vpack.i.bf16 %v260_v3, %v259_v2 }
  0x9b   :  { %v299_v15 = vmul.f32 %v1165_v22, %v1095_v45 }
  0x9e   :  { %v289_v23 = vpop.permute.xlu1 %288  ;;  %v287_v24 = vpop.permute.xlu0 %286 }
  0x9f   :  { %v292_v58 = vsel %vm290_vm5, %v1163_v21, %v287_v24  ;;  %v293_v59 = vsel %vm290_vm5, %v287_v24, %v289_v23  ;;  %v303_v6 = vmul.f32 %v289_v23, %v1154_v17  ;;  %v157_v23 = vmul.f32 %v1141_v9, %v1114_v52 }
  0xa0   :  { %v301_v61 = vmul.f32 %v292_v58, %v1109_v51  ;;  %v302_v63 = vmul.f32 %v293_v59, %v1114_v52  ;;  %v199_v9 = vmul.f32 %v1145_v13, %v1114_v52  ;;  %v291_v13 = vsel %vm290_vm5, %v1165_v22, %v1163_v21 }
  0xa1   :  { %v918_v33 = vpack.i.bf16 %v157_v23, %v156_v27  ;;  %v300_v18 = vmul.f32 %v291_v13, %v1100_v46 }
  0xa2   :  { %v1167_v25 = vpop.permute.xlu1 %326  ;;  %v325_v26 = vpop.permute.xlu0 %324  ;;  %v948_v16 = vpack.i.bf16 %v302_v63, %v301_v61 }
  0xa3   :  { %v333_v0 = vsel %vm332_vm6, %v325_v26, %v1167_v25  ;;  %v341_v11 = vmul.f32 %v325_v26, %v1095_v45  ;;  %v943_v38 = vpack.i.bf16 %v300_v18, %v299_v15 }
  0xa4   :  { %v342_v12 = vmul.f32 %v333_v0, %v1100_v46 }
  0xa6   :  { %v1170_v28 = vpop.permute.xlu1 %330  ;;  %v1172_v29 = vpop.permute.xlu0 %328  ;;  %v953_v26 = vpack.i.bf16 %v342_v12, %v341_v11 }
  0xa7   :  { %v345_v32 = vmul.f32 %v1170_v28, %v1154_v17 }
  0xa9   :  { %544 = vrot.lane.b32.xlu1 %v345_v32, %s981_s0  ;;  %v198_v32 = vmul.f32 %v189_v10, %v1109_v51 }
  0xaa   :  { %v369_v35 = vpop.permute.xlu1 %368  ;;  %v367_v36 = vpop.permute.xlu0 %366 }
  0xab   :  { %v375_v39 = vsel %vm374_vm2, %v367_v36, %v369_v35  ;;  %v383_v40 = vmul.f32 %v367_v36, %v1095_v45  ;;  %v334_v36 = vsel %vm332_vm6, %v1167_v25, %v1172_v29 }
  0xac   :  { %v384_v42 = vmul.f32 %v375_v39, %v1100_v46  ;;  %v343_v21 = vmul.f32 %v334_v36, %v1109_v51 }
  0xad   :  { %909 = vrot.lane.b32.xlu1 %v908_v37, %s973_s25  ;;  %v335_v37 = vsel %vm332_vm6, %v1172_v29, %v1170_v28 }
  0xae   :  { %v898_v47 = vpack.i.bf16 %v384_v42, %v383_v40  ;;  %v373_v1 = vpop.permute.xlu1 %372  ;;  %v371_v5 = vpop.permute.xlu0 %370  ;;  %v344_v39 = vmul.f32 %v335_v37, %v1114_v52 }
  0xaf   :  { %v376_v20 = vsel %vm374_vm2, %v369_v35, %v371_v5  ;;  %v377_v24 = vsel %vm374_vm2, %v371_v5, %v373_v1  ;;  %v387_v40 = vmul.f32 %v373_v1, %v1154_v17 }
  0xb0   :  { %899 = vrot.lane.b32.xlu0 %v898_v47, %s982_s28  ;;  %v385_v30 = vmul.f32 %v376_v20, %v1109_v51  ;;  %v386_v31 = vmul.f32 %v377_v24, %v1114_v52  ;;  %v963_v22 = vpack.i.bf16 %v344_v39, %v343_v21 }
  0xb1   :  { %914 = vrot.lane.b32.xlu1 %v913_v49, %s979_s22 }
  0xb2   :  { %v958_v35 = vpack.i.bf16 %v386_v31, %v385_v30  ;;  %v55_v25 = vpop.permute.xlu1 %54  ;;  %v1273_v29 = vpop.permute.xlu0 %52 }
  0xb4   :  { %393 = vrot.lane.b32.xlu0 %v111_v54, %s973_s25 }
  0xb5   :  { %924 = vrot.lane.b32.xlu1 %v923_v57, %s971_s23 }
  0xb6   :  { %v59_v41 = vpop.permute.xlu1 %58  ;;  %v57_v44 = vpop.permute.xlu0 %56 }
  0xb7   :  { %v62_v3 = vsel %vm60_vm8, %v55_v25, %v57_v44 }
  0xb8   :  { %442 = vrot.lane.b32.xlu0 %v195_v60, %s971_s23  ;;  %v71_v21 = vmul.f32 %v62_v3, %v1100_v46 }
  0xb9   :  { %934 = vrot.lane.b32.xlu1 %v933_v62, %s980_s27  ;;  %v73_v62 = vmul.f32 %v59_v41, %v1114_v52 }
  0xba   :  { %v1269_v42 = vpop.permute.xlu1 %889  ;;  %v1279_v48 = vpop.permute.xlu0 %894 }
  0xbc   :  { %519 = vrot.lane.b32.xlu0 %v303_v6, %s983_s29 }
  0xbd   :  { %949 = vrot.lane.b32.xlu1 %v948_v16, %s983_s29 }
  0xc0   :  { %904 = vrot.lane.b32.xlu0 %v903_v7, %s973_s25  ;;  %v928_v7 = vpack.i.bf16 %v199_v9, %v198_v32  ;;  %v891_v32 = vunpack.i.l.bf16 %v1269_v42 }
  0xc1   :  { %954 = vrot.lane.b32.xlu1 %v953_v26, %s981_s0 }
  0xc4   :  { %919 = vrot.lane.b32.xlu0 %v918_v33, %s979_s22  ;;  %v61_v33 = vsel %vm60_vm8, %v1273_v29, %v55_v25 }
  0xc5   :  { %959 = vrot.lane.b32.xlu1 %v958_v35, %s982_s28  ;;  %v70_v15 = vmul.f32 %v61_v33, %v1095_v45 }
  0xc8   :  { %929 = vrot.lane.b32.xlu0 %v928_v7, %s971_s23 }
  0xcc   :  { %939 = vrot.lane.b32.xlu0 %v938_v19, %s980_s27  ;;  %v63_v19 = vsel %vm60_vm8, %v57_v44, %v59_v41 }
  0xcd   :  { %v72_v25 = vmul.f32 %v63_v19, %v1109_v51  ;;  %v69_v51 = vmul.f32 %v1273_v29, %v1135_v4  ;;  %v892_v4 = vunpack.i.h.bf16 %v1269_v42 }
  0xd0   :  { %944 = vrot.lane.b32.xlu0 %v943_v38, %s983_s29 }
  0xd4   :  { %964 = vrot.lane.b32.xlu0 %v963_v22, %s981_s0 }
  0xd8   :  { %569 = vrot.lane.b32.xlu0 %v387_v40, %s982_s28 }
  0xf7   :  { %v1271_v28 = vpop.permute.xlu1 %417 }
 0x10b   :  { %v1275_v43 = vpop.permute.xlu1 %494 }
 0x11b   :  { %v1277_v47 = vpop.permute.xlu1 %544 }
 0x11f   :  { %v910_v49 = vpop.permute.xlu1 %909 }
 0x120   :  { %v912_v57 = vunpack.i.h.bf16 %v910_v49  ;;  %v911_v7 = vunpack.i.l.bf16 %v910_v49 }
 0x122   :  { %v900_v50 = vpop.permute.xlu0 %899  ;;  %v585_v61 = vpack.c.bf16 %v912_v57, %v73_v62  ;;  %v406_v40 = vsel %vm186_vm3, %v911_v7, %v912_v57 }
 0x123   :  { %v902_v17 = vunpack.i.h.bf16 %v900_v50  ;;  %v901_v53 = vunpack.i.l.bf16 %v900_v50  ;;  %v1281_v54 = vpop.permute.xlu1 %914  ;;  %v584_v46 = vpack.c.bf16 %v406_v40, %v72_v25 }
 0x124   :  { %v917_v39 = vunpack.i.h.bf16 %v1281_v54  ;;  %v916_v22 = vunpack.i.l.bf16 %v1281_v54 }
 0x125   :  { %v601_v55 = vpack.c.bf16 %v901_v53, %v901_v53  ;;  %v572_v56 = vsel %vm571_vm7, %v901_v53, %v902_v17 }
 0x126   :  { %v1284_v58 = vpop.permute.xlu0 %393  ;;  %v602_v59 = vpack.c.bf16 %v572_v56, %v572_v56 }
 0x127   :  { %690 = vrot.lane.b32.xlu1 %v601_v55, %s977_s7  ;;  %v1287_v60 = vpop.permute.xlu1 %924 }
 0x128   :  { %692 = vrot.lane.b32.xlu0 %v602_v59, %s977_s7  ;;  %v927_v36 = vunpack.i.h.bf16 %v1287_v60  ;;  %v926_v37 = vunpack.i.l.bf16 %v1287_v60 }
 0x12a   :  { %v1291_v63 = vpop.permute.xlu0 %442  ;;  %v453_v49 = vsel %vm102_vm0, %v926_v37, %v927_v36 }
 0x12b   :  { %v1293_v0 = vpop.permute.xlu1 %934  ;;  %v452_v29 = vsel %vm102_vm0, %v1291_v63, %v926_v37  ;;  %v897_v63 = vunpack.i.h.bf16 %v1279_v48  ;;  %v984_v37 = vmov 0  }
 0x12c   :  { %658 = vrot.lane.b32.xlu0 %v585_v61, %s977_s7  ;;  %v936_v26 = vunpack.i.l.bf16 %v1293_v0  ;;  %v937_v57 = vunpack.i.h.bf16 %v1293_v0  ;;  %786 = vmatprep.mubr.bf16.mxu0 %v984_v37 }
 0x12d   :  { %829 = vmatprep.mubr.bf16.mxu1 %v984_v37  ;;  %969 = vset.pattern.permute.xlu1 %v984_v37 }
 0x12e   :  { %v1296_v1 = vpop.permute.xlu0 %519  ;;  %v591_v34 = vpack.c.bf16 %v936_v26, %v891_v32  ;;  %968 = vset.pattern.permute.xlu0 %v984_v37 }
 0x12f   :  { %v1298_v5 = vpop.permute.xlu1 %949 }
 0x130   :  { %v951_v3 = vunpack.i.l.bf16 %v1298_v5 }
 0x132   :  { %v905_v6 = vpop.permute.xlu0 %904 }
 0x133   :  { %v1300_v8 = vpop.permute.xlu1 %954  ;;  %v907_v31 = vunpack.i.h.bf16 %v905_v6  ;;  %v906_v9 = vunpack.i.l.bf16 %v905_v6  ;;  %v896_v6 = vunpack.i.l.bf16 %v1279_v48 }
 0x134   :  { %v956_v35 = vunpack.i.l.bf16 %v1300_v8 }
 0x135   :  { %v404_v13 = vsel %vm186_vm3, %v906_v9, %v907_v31  ;;  %v405_v38 = vsel %vm186_vm3, %v907_v31, %v911_v7  ;;  %v403_v53 = vsel %vm186_vm3, %v1284_v58, %v906_v9  ;;  %v957_v9 = vunpack.i.h.bf16 %v1300_v8 }
 0x136   :  { %v1302_v11 = vpop.permute.xlu0 %919  ;;  %v582_v45 = vpack.c.bf16 %v404_v13, %v70_v15  ;;  %v583_v41 = vpack.c.bf16 %v405_v38, %v71_v21  ;;  %v581_v56 = vpack.c.bf16 %v403_v53, %v69_v51  ;;  %v475_v48 = vsel %vm60_vm8, %v896_v6, %v897_v63 }
 0x137   :  { %v1304_v12 = vpop.permute.xlu1 %959  ;;  %v922_v27 = vunpack.i.h.bf16 %v1302_v11  ;;  %v921_v50 = vunpack.i.l.bf16 %v1302_v11  ;;  %v428_v11 = vsel %vm427_vm9, %v1271_v28, %v916_v22  ;;  %v474_v28 = vsel %vm60_vm8, %v892_v4, %v896_v6 }
 0x138   :  { %v961_v52 = vunpack.i.l.bf16 %v1304_v12  ;;  %v586_v42 = vpack.c.bf16 %v452_v29, %v428_v11  ;;  %v547_v38 = vsel %vm546_vm11, %v956_v35, %v957_v9 }
 0x139   :  { %v431_v59 = vsel %vm427_vm9, %v921_v50, %v922_v27  ;;  %v430_v61 = vsel %vm427_vm9, %v917_v39, %v921_v50 }
 0x13a   :  { %v930_v16 = vpop.permute.xlu0 %929  ;;  %v573_v20 = vsel %vm571_vm7, %v902_v17, %v961_v52  ;;  %v429_v17 = vsel %vm427_vm9, %v916_v22, %v917_v39 }
 0x13b   :  { %v932_v24 = vunpack.i.h.bf16 %v930_v16  ;;  %v603_v23 = vpack.c.bf16 %v573_v20, %v573_v20  ;;  %v931_v44 = vunpack.i.l.bf16 %v930_v16  ;;  %v587_v54 = vpack.c.bf16 %v453_v49, %v429_v17 }
 0x13c   :  { %v497_v20 = vsel %vm496_vm10, %v936_v26, %v937_v57 }
 0x13d   :  { %694 = vrot.lane.b32.xlu1 %v603_v23, %s977_s7  ;;  %v590_v30 = vpack.c.bf16 %v932_v24, %v922_v27  ;;  %v455_v55 = vsel %vm102_vm0, %v931_v44, %v932_v24  ;;  %v454_v60 = vsel %vm102_vm0, %v927_v36, %v931_v44  ;;  %v473_v23 = vsel %vm60_vm8, %v891_v32, %v892_v4  ;;  %v608_v44 = vld [vmem:[%s1487_s3] sm:$0xff] }
 0x13e   :  { %v1312_v10 = vpop.permute.xlu0 %939  ;;  %v589_v58 = vpack.c.bf16 %v455_v55, %v431_v59  ;;  %v588_v0 = vpack.c.bf16 %v454_v60, %v430_v61 }
 0x13f   :  { %v941_v62 = vunpack.i.l.bf16 %v1312_v10  ;;  %v942_v16 = vunpack.i.h.bf16 %v1312_v10 }
 0x141   :  { %668 = vrot.lane.b32.xlu1 %v590_v30, %s977_s7  ;;  %v498_v27 = vsel %vm496_vm10, %v937_v57, %v941_v62  ;;  %v592_v30 = vpack.c.bf16 %v497_v20, %v473_v23  ;;  %v499_v10 = vsel %vm496_vm10, %v941_v62, %v942_v16  ;;  %v500_v32 = vsel %vm496_vm10, %v942_v16, %v1275_v43 }
 0x142   :  { %v1319_v14 = vpop.permute.xlu0 %944  ;;  %v593_v26 = vpack.c.bf16 %v498_v27, %v474_v28  ;;  %v595_v15 = vpack.c.bf16 %v500_v32, %v897_v63 }
 0x143   :  { %v946_v2 = vunpack.i.l.bf16 %v1319_v14  ;;  %v947_v33 = vunpack.i.h.bf16 %v1319_v14 }
 0x145   :  { %v596_v18 = vpack.c.bf16 %v956_v35, %v946_v2  ;;  %670 = vrot.lane.b32.xlu1 %v591_v34, %s977_s7  ;;  %v594_v34 = vpack.c.bf16 %v499_v10, %v475_v48  ;;  %v523_v19 = vsel %vm521_vm12, %v947_v33, %v951_v3  ;;  %v522_v43 = vsel %vm521_vm12, %v946_v2, %v947_v33 }
 0x146   :  { %v965_v24 = vpop.permute.xlu0 %964  ;;  %v597_v14 = vpack.c.bf16 %v547_v38, %v522_v43  ;;  %v962_v2 = vunpack.i.h.bf16 %v1304_v12  ;;  %v985_v38 = vmov 0.0  }
 0x147   :  { %680 = vrot.lane.b32.xlu0 %v596_v18, %s977_s7  ;;  %v966_v31 = vunpack.i.l.bf16 %v965_v24  ;;  %v967_v7 = vunpack.i.h.bf16 %v965_v24  ;;  %v952_v18 = vunpack.i.h.bf16 %v1298_v5  ;;  %848 = vst [vmem:[%s1488_s4] sm:$0xff] %v985_v38  ;;  %849 = vst [vmem:[%s1488_s4 + $0x30] sm:$0xff] %v985_v38 }
 0x148   :  { %v574_v40 = vsel %vm571_vm7, %v961_v52, %v962_v2  ;;  %850 = vst [vmem:[%s1488_s4 + $0x28] sm:$0xff] %v985_v38  ;;  %851 = vst [vmem:[%s1488_s4 + $0x58] sm:$0xff] %v985_v38 }
 0x149   :  { %652 = vrot.lane.b32.xlu1 %v582_v45, %s977_s7  ;;  %v548_v13 = vsel %vm546_vm11, %v957_v9, %v966_v31  ;;  %v550_v21 = vsel %vm546_vm11, %v967_v7, %v1277_v47  ;;  %v525_v45 = vsel %vm521_vm12, %v952_v18, %v1296_v1  ;;  %v549_v39 = vsel %vm546_vm11, %v966_v31, %v967_v7 }
 0x14a   :  { %v598_v36 = vpack.c.bf16 %v548_v13, %v523_v19  ;;  %v570_v5 = vpop.permute.xlu0 %569  ;;  %v600_v8 = vpack.c.bf16 %v550_v21, %v525_v45  ;;  %v524_v47 = vsel %vm521_vm12, %v951_v3, %v952_v18  ;;  %v604_v1 = vpack.c.bf16 %v574_v40, %v574_v40 }
 0x14b   :  { %654 = vrot.lane.b32.xlu0 %v583_v41, %s977_s7  ;;  %v575_v35 = vsel %vm571_vm7, %v962_v2, %v570_v5  ;;  %v599_v22 = vpack.c.bf16 %v549_v39, %v524_v47  ;;  %v609_v41 = vld [vmem:[%s1487_s3 + $0x8] sm:$0xff] }
 0x14c   :  { %v605_v25 = vpack.c.bf16 %v575_v35, %v575_v35 }
 0x14d   :  { %656 = vrot.lane.b32.xlu1 %v584_v46, %s977_s7 }
 0x14f   :  { %662 = vrot.lane.b32.xlu0 %v587_v54, %s977_s7 }
 0x151   :  { %650 = vrot.lane.b32.xlu1 %v581_v56, %s977_s7 }
 0x153   :  { %666 = vrot.lane.b32.xlu0 %v589_v58, %s977_s7 }
 0x155   :  { %664 = vrot.lane.b32.xlu1 %v588_v0, %s977_s7 }
 0x157   :  { %660 = vrot.lane.b32.xlu0 %v586_v42, %s977_s7 }
 0x159   :  { %672 = vrot.lane.b32.xlu1 %v592_v30, %s977_s7 }
 0x15b   :  { %674 = vrot.lane.b32.xlu0 %v593_v26, %s977_s7 }
 0x15d   :  { %676 = vrot.lane.b32.xlu1 %v594_v34, %s977_s7 }
 0x15f   :  { %678 = vrot.lane.b32.xlu0 %v595_v15, %s977_s7  ;;  %v970_v15 = vld [vmem:[%s1486_s2] sm:$0xff]  }
 0x161   :  { %684 = vrot.lane.b32.xlu1 %v598_v36, %s977_s7 }
 0x163   :  { %682 = vrot.lane.b32.xlu0 %v597_v14, %s977_s7 }
 0x165   :  { %688 = vrot.lane.b32.xlu1 %v600_v8, %s977_s7 }
 0x167   :  { %686 = vrot.lane.b32.xlu0 %v599_v22, %s977_s7 }
 0x169   :  { %698 = vrot.lane.b32.xlu1 %v605_v25, %s977_s7 }
 0x16b   :  { %696 = vrot.lane.b32.xlu0 %v604_v1, %s977_s7 }
 0x16d   :  { %617 = vperm.xlu1 %969, %v609_v41  }
 0x16f   :  { %612 = vperm.xlu0 %968, %v608_v44  }
 0x199   :  { %v691_v12 = vpop.permute.xlu1 %690 }
 0x19a   :  { %v693_v52 = vpop.permute.xlu0 %692 }
 0x19b   :  { %v717_v48 = vsel %vm374_vm2, %v691_v12, %v693_v52 }
 0x19c   :  { %v743_v13 = vsel %vm741_vm13, %v717_v48, 0 }
 0x19e   :  { %v659_v50 = vpop.permute.xlu0 %658 }
 0x1af   :  { %v1417_v49 = vpop.permute.xlu1 %694 }
 0x1b0   :  { %v718_v32 = vsel %vm374_vm2, %v693_v52, %v1417_v49 }
 0x1b3   :  { %v669_v46 = vpop.permute.xlu1 %668 }
 0x1b7   :  { %v671_v17 = vpop.permute.xlu1 %670 }
 0x1b9   :  { %v681_v53 = vpop.permute.xlu0 %680 }
 0x1bb   :  { %v653_v51 = vpop.permute.xlu1 %652 }
 0x1bd   :  { %v655_v54 = vpop.permute.xlu0 %654 }
 0x1be   :  { %v702_v55 = vsel %vm374_vm2, %v653_v51, %v655_v54 }
 0x1bf   :  { %754 = vmatprep.subr.bf16.mxu0 %v702_v55  ;;  %v657_v56 = vpop.permute.xlu1 %656 }
 0x1c0   :  { %v704_v57 = vsel %vm374_vm2, %v657_v56, %v659_v50  ;;  %v703_v59 = vsel %vm374_vm2, %v655_v54, %v657_v56 }
 0x1c1   :  { %v663_v60 = vpop.permute.xlu0 %662  ;;  %797 = vmatprep.subr.bf16.mxu1 %v704_v57 }
 0x1c2   :  { %798 = vmatpush1.bf16.msra.mxu1 %v703_v59 }
 0x1c3   :  { %v651_v58 = vpop.permute.xlu1 %650 }
 0x1c4   :  { %v701_v4 = vsel %vm374_vm2, %v651_v58, %v653_v51 }
 0x1c5   :  { %v667_v29 = vpop.permute.xlu0 %666  ;;  %755 = vmatpush1.bf16.msra.mxu0 %v701_v4 }
 0x1c6   :  { %v708_v62 = vsel %vm374_vm2, %v667_v29, %v669_v46 }
 0x1c7   :  { %799 = vmatprep.subr.bf16.mxu1 %v708_v62  ;;  %v665_v61 = vpop.permute.xlu1 %664 }
 0x1c8   :  { %v706_v0 = vsel %vm374_vm2, %v663_v60, %v665_v61  ;;  %v707_v6 = vsel %vm374_vm2, %v665_v61, %v667_v29 }
 0x1c9   :  { %v661_v11 = vpop.permute.xlu0 %660  ;;  %756 = vmatprep.subr.bf16.mxu0 %v706_v0  ;;  %800 = vmatpush1.bf16.msra.mxu1 %v707_v6 }
 0x1ca   :  { %v705_v16 = vsel %vm374_vm2, %v661_v11, %v663_v60 }
 0x1cb   :  { %757 = vmatpush1.bf16.msra.mxu0 %v705_v16  ;;  %v673_v20 = vpop.permute.xlu1 %672 }
 0x1cc   :  { %v709_v23 = vsel %vm374_vm2, %v671_v17, %v673_v20 }
 0x1cd   :  { %v675_v42 = vpop.permute.xlu0 %674 }
 0x1ce   :  { %v710_v24 = vsel %vm374_vm2, %v673_v20, %v675_v42 }
 0x1cf   :  { %758 = vmatprep.subr.bf16.mxu0 %v710_v24  ;;  %v677_v63 = vpop.permute.xlu1 %676 }
 0x1d0   :  { %759 = vmatpush1.bf16.msra.mxu0 %v709_v23  ;;  %v711_v28 = vsel %vm374_vm2, %v675_v42, %v677_v63 }
 0x1d1   :  { %v679_v27 = vpop.permute.xlu0 %678 }
 0x1d2   :  { %v712_v30 = vsel %vm374_vm2, %v677_v63, %v679_v27 }
 0x1d3   :  { %801 = vmatprep.subr.bf16.mxu1 %v712_v30  ;;  %v685_v31 = vpop.permute.xlu1 %684 }
 0x1d4   :  { %802 = vmatpush1.bf16.msra.mxu1 %v711_v28 }
 0x1d5   :  { %v683_v10 = vpop.permute.xlu0 %682 }
 0x1d6   :  { %v714_v26 = vsel %vm374_vm2, %v683_v10, %v685_v31  ;;  %v713_v9 = vsel %vm374_vm2, %v681_v53, %v683_v10 }
 0x1d7   :  { %760 = vmatprep.subr.bf16.mxu0 %v714_v26  ;;  %v689_v33 = vpop.permute.xlu1 %688 }
 0x1d8   :  { %761 = vmatpush1.bf16.msra.mxu0 %v713_v9 }
 0x1d9   :  { %v687_v34 = vpop.permute.xlu0 %686  ;;  %869 = vmatprep.subr.msk.bf16.mxu0 %vm741_vm13, %v718_v32 }
 0x1da   :  { %v716_v3 = vsel %vm374_vm2, %v687_v34, %v689_v33  ;;  %v715_v7 = vsel %vm374_vm2, %v685_v31, %v687_v34 }
 0x1db   :  { %803 = vmatprep.subr.bf16.mxu1 %v716_v3  ;;  %v699_v18 = vpop.permute.xlu1 %698 }
 0x1dc   :  { %763 = vmatpush1.bf16.msra.mxu0 %v743_v13  ;;  %804 = vmatpush1.bf16.msra.mxu1 %v715_v7 }
 0x1dd   :  { %v697_v19 = vpop.permute.xlu0 %696 }
 0x1de   :  { %v719_v43 = vsel %vm374_vm2, %v1417_v49, %v697_v19  ;;  %v720_v36 = vsel %vm374_vm2, %v697_v19, %v699_v18 }
 0x1df   :  { %871 = vmatprep.subr.msk.bf16.mxu1 %vm741_vm13, %v720_v36  ;;  %870 = vmatmul.mubr.msk.bf16.vlgmr.msra.gmra.mrb[0].mxu0 %vm737_vm14, %v970_v15  ;;  %v749_v37 = vsel %vm741_vm13, %v719_v43, 0 }
 0x1e0   :  { %806 = vmatpush1.bf16.msra.mxu1 %v749_v37 }
 0x1e3   :  { %872 = vmatmul.mubr.msk.bf16.vlgmr.msra.gmra.mrb[0].mxu1 %vm737_vm14, %v970_v15 }
 0x1ec   :  { %v618_v14 = vpop.permute.xlu1 %617 }
 0x1ee   :  { %v613_v21 = vpop.permute.xlu0 %612 }
 0x2b2   :  { %v788_v5 = vpop.f32.mrb[0].mxu0 }
 0x2b3   :  { %v790_v2 = vpop.f32.mrb[1].mxu0  ;;  %v789_v45 = vadd.f32 %v788_v5, %v613_v21 }
 0x2b4   :  { %v792_v39 = vpop.f32.mrb[2].mxu0  ;;  %v791_v8 = vadd.f32 %v790_v2, %v613_v21 }
 0x2b5   :  { %v840_v35 = vadd.f32 0.5, %v789_v45  ;;  %v794_v47 = vpop.f32.mrb[3].mxu0  ;;  %v793_v22 = vadd.f32 %v792_v39, %v618_v14 }
 0x2b6   :  { %v841_v40 = vadd.f32 0.5, %v791_v8  ;;  %v831_v25 = vpop.f32.mrb[0].mxu1  ;;  %v795_v1 = vadd.f32 %v794_v47, %v618_v14 }
 0x2b7   :  { %852 = vst [vmem:[%s1488_s4 + $0x8] sm:$0xff] %v840_v35  ;;  %v832_v41 = vadd.f32 %v831_v25, %v613_v21  ;;  %v844_v44 = vadd.f32 0.5, %v793_v22  ;;  %v833_v12 = vpop.f32.mrb[1].mxu1 }
 0x2b8   :  { %853 = vst [vmem:[%s1488_s4 + $0x10] sm:$0xff] %v841_v40  ;;  %v845_v52 = vadd.f32 0.5, %v795_v1  ;;  %v834_v49 = vadd.f32 %v833_v12, %v613_v21  ;;  %v835_v46 = vpop.f32.mrb[2].mxu1 }
 0x2b9   :  { %v842_v50 = vadd.f32 0.5, %v832_v41  ;;  %856 = vst [vmem:[%s1488_s4 + $0x38] sm:$0xff] %v844_v44  ;;  %v836_v17 = vadd.f32 %v835_v46, %v618_v14  ;;  %v837_v53 = vpop.f32.mrb[3].mxu1 }
 0x2ba   :  { %857 = vst [vmem:[%s1488_s4 + $0x40] sm:$0xff] %v845_v52  ;;  %v843_v51 = vadd.f32 0.5, %v834_v49  ;;  %v838_v54 = vadd.f32 %v837_v53, %v618_v14 }
 0x2bb   :  { %854 = vst [vmem:[%s1488_s4 + $0x18] sm:$0xff] %v842_v50  ;;  %v846_v55 = vadd.f32 0.5, %v836_v17 }
 0x2bc   :  { %855 = vst [vmem:[%s1488_s4 + $0x20] sm:$0xff] %v843_v51  ;;  %v847_v56 = vadd.f32 0.5, %v838_v54 }
 0x2bd   :  { %858 = vst [vmem:[%s1488_s4 + $0x48] sm:$0xff] %v846_v55 }
 0x2be   :  { %859 = vst [vmem:[%s1488_s4 + $0x50] sm:$0xff] %v847_v56 }

// kernel: repsr_forward.5
= control target key start
LH: loop header
LB: loop body
LE: loop exit
PB: predicated region body
PF: predicated region fallthrough
CT: control target
= control target key end

     0   :  { %v44_v0 = vlaneseq  ;;  %v1307_v10 = vmov 0.0   ;;  %s1308_s17 = smov 112   ;;  %s1309_s18 = smov 113   ;;  %vm114_vm0 = vcmask 916480   ;;  %vm156_vm1 = vcmask 924672   ;;  %s1988_s1 = inlined_call_operand.vmem [shape: f32[9,512], index: 1, kind: input, shape index: {}]   ;;  %s1989_s0 = inlined_call_operand.vmem [shape: f32[8,768], index: 0, kind: input, shape index: {}, may-alias: {0,8}]   ;;  %s1990_s8 = inlined_call_operand.vmem [shape: f32[8,768], index: 8, kind: output, shape index: {}, may-alias: {0,8}]   ;;  %s1991_s2 = inlined_call_operand.vmem [shape: bf16[32,72], index: 2, kind: input, shape index: {}]   ;;  %s1992_s3 = inlined_call_operand.vmem [shape: f32[32,1], index: 3, kind: input, shape index: {}]   ;;  %s1993_s5 = inlined_call_operand.vmem [shape: f32[32,1], index: 5, kind: input, shape index: {}]   ;;  %s1994_s4 = inlined_call_operand.vmem [shape: f32[32,1], index: 4, kind: input, shape index: {}]   ;;  %s1995_s7 = inlined_call_operand.vmem [shape: f32[8,1], index: 7, kind: input, shape index: {}]   ;;  %s1996_s6 = inlined_call_operand.vmem [shape: bf16[8,32], index: 6, kind: input, shape index: {}]  }
   0x1   :  { %v1372_v2 = vld [vmem:[%s1988_s1 + $0x10] sm:$0xff]  ;;  %v1377_v3 = vld [vmem:[%s1988_s1] sm:$0xff]  ;;  %v1383_v5 = vld [vmem:[%s1988_s1 + $0x18] sm:$0xff]  ;;  %s1310_s23 = smov 127   ;;  %s1311_s24 = smov 1   ;;  %vm198_vm2 = vcmask 1039360  }
   0x2   :  { %v1367_v1 = vshrl.u32 %v44_v0, 7  ;;  %v1388_v6 = vld [vmem:[%s1988_s1 + $0x8] sm:$0xff]  ;;  %v1393_v7 = vld [vmem:[%s1989_s0] sm:$0xff]  ;;  %s1312_s25 = smov 15   ;;  %s1313_s26 = smov 16   ;;  %vm260_vm3 = vcmask 7168  }
   0x3   :  { %1172 = vst [vmem:[%s1990_s8] sm:$0xff] %v1307_v10  ;;  %v1183_v39 = vld [vmem:[%s1988_s1 + $0x28] ss:$0 sm:$0xff]  ;;  %v1182_v40 = vld [vmem:[%s1988_s1 + $0x20] ss:$0 sm:$0xff]  ;;  %s1314_s9 = smov 17   ;;  %s1315_s22 = smov 111  }
   0x4   :  { %v88_v4 = vsub.s32 1, %v1367_v1  ;;  %v130_v13 = vsub.s32 2, %v1367_v1  ;;  %v172_v18 = vsub.s32 3, %v1367_v1  ;;  %v234_v24 = vsub.s32 5, %v1367_v1  ;;  %v1185_v43 = vld [vmem:[%s1988_s1 + $0x38] ss:$0 sm:$0xff] }
   0x5   :  { %v276_v29 = vsub.s32 6, %v1367_v1  ;;  %v318_v32 = vsub.s32 7, %v1367_v1  ;;  %v46_v41 = vsub.s32 0, %v1367_v1  ;;  %v214_v42 = vsub.s32 4, %v1367_v1  ;;  %v1184_v44 = vld [vmem:[%s1988_s1 + $0x30] ss:$0 sm:$0xff] }
   0x6   :  { %v97_v8 = vrot.slane %v1372_v2, %v88_v4  ;;  %v89_v9 = vrot.slane %v1377_v3, %v88_v4  ;;  %v101_v11 = vrot.slane %v1383_v5, %v88_v4  ;;  %v93_v12 = vrot.slane %v1388_v6, %v88_v4  ;;  %s1319_s27 = smov 95  }
   0x7   :  { %v135_v14 = vrot.slane %v1388_v6, %v130_v13  ;;  %v131_v15 = vrot.slane %v1377_v3, %v130_v13  ;;  %v143_v16 = vrot.slane %v1383_v5, %v130_v13  ;;  %v139_v17 = vrot.slane %v1372_v2, %v130_v13 }
   0x8   :  { %110 = vrot.lane.b32.xlu1 %v97_v8, %s1308_s17  ;;  %106 = vrot.lane.b32.xlu0 %v89_v9, %s1308_s17  ;;  %v177_v19 = vrot.slane %v1388_v6, %v172_v18  ;;  %v173_v20 = vrot.slane %v1377_v3, %v172_v18  ;;  %v185_v22 = vrot.slane %v1383_v5, %v172_v18  ;;  %vm302_vm4 = vcmask 121856  }
   0x9   :  { %v181_v23 = vrot.slane %v1372_v2, %v172_v18  ;;  %v239_v25 = vrot.slane %v1388_v6, %v234_v24  ;;  %v235_v26 = vrot.slane %v1377_v3, %v234_v24  ;;  %v247_v27 = vrot.slane %v1383_v5, %v234_v24 }
   0xa   :  { %v1417_v21 = vld [vmem:[%s1989_s0 + $0x28] sm:$0xff]  ;;  %v243_v28 = vrot.slane %v1372_v2, %v234_v24  ;;  %v281_v30 = vrot.slane %v1388_v6, %v276_v29  ;;  %v277_v31 = vrot.slane %v1377_v3, %v276_v29  ;;  %v319_v33 = vrot.slane %v1377_v3, %v318_v32 }
   0xb   :  { %1173 = vst [vmem:[%s1990_s8 + $0x28] sm:$0xff] %v1307_v10  ;;  %v285_v34 = vrot.slane %v1372_v2, %v276_v29  ;;  %v327_v35 = vrot.slane %v1372_v2, %v318_v32  ;;  %v323_v36 = vrot.slane %v1388_v6, %v318_v32  ;;  %v331_v37 = vrot.slane %v1383_v5, %v318_v32 }
   0xc   :  { %112 = vrot.lane.b32.xlu1 %v101_v11, %s1308_s17  ;;  %108 = vrot.lane.b32.xlu0 %v93_v12, %s1308_s17  ;;  %v289_v38 = vrot.slane %v1383_v5, %v276_v29  ;;  %v47_v45 = vrot.slane %v1377_v3, %v46_v41  ;;  %v51_v46 = vrot.slane %v1388_v6, %v46_v41  ;;  %vm344_vm5 = vcmask 130048  }
   0xd   :  { %v223_v47 = vrot.slane %v1372_v2, %v214_v42  ;;  %v227_v49 = vrot.slane %v1383_v5, %v214_v42  ;;  %v215_v50 = vrot.slane %v1377_v3, %v214_v42  ;;  %v219_v51 = vrot.slane %v1388_v6, %v214_v42 }
   0xe   :  { %v55_v55 = vrot.slane %v1372_v2, %v46_v41  ;;  %v59_v57 = vrot.slane %v1383_v5, %v46_v41  ;;  %vm386_vm6 = vcmask 138240   ;;  %vm72_vm7 = vcmask 908288  }
   0xf   :  { %vm508_vm8 = vcmask 900096   ;;  %vm533_vm9 = vcmask 785408   ;;  %vm558_vm10 = vcmask 777216   ;;  %vm583_vm11 = vcmask 769024  }
  0x10   :  { %150 = vrot.lane.b32.xlu1 %v135_v14, %s1309_s18  ;;  %148 = vrot.lane.b32.xlu0 %v131_v15, %s1309_s18  ;;  %vm439_vm12 = vcmask 1031168   ;;  %vm775_vm13 = vcmask 1043456   ;;  %vm768_vm14 = vcmask 588800   ;;  %vm1082_vm15 = vcmask 261120  }
  0x12   :  { %v1467_v48 = vld [vmem:[%s1989_s0 + $0x18] sm:$0xff]  ;;  %v1475_v52 = vld [vmem:[%s1989_s0 + $0x20] sm:$0xff]  ;;  %v1480_v53 = vld [vmem:[%s1989_s0 + $0x8] sm:$0xff] }
  0x13   :  { %v1485_v54 = vld [vmem:[%s1989_s0 + $0x10] sm:$0xff]  ;;  %v230_v56 = vmul.f32 %v223_v47, %v1467_v48  ;;  %v231_v58 = vmul.f32 %v227_v49, %v1475_v52  ;;  %v228_v59 = vmul.f32 %v215_v50, %v1480_v53 }
  0x14   :  { %154 = vrot.lane.b32.xlu1 %v143_v16, %s1309_s18  ;;  %152 = vrot.lane.b32.xlu0 %v139_v17, %s1309_s18  ;;  %v229_v60 = vmul.f32 %v219_v51, %v1485_v54 }
  0x15   :  { %v1216_v61 = vpack.i.bf16 %v231_v58, %v230_v56 }
  0x16   :  { %v1211_v62 = vpack.i.bf16 %v229_v60, %v228_v59 }
  0x18   :  { %192 = vrot.lane.b32.xlu1 %v177_v19, %s1310_s23  ;;  %190 = vrot.lane.b32.xlu0 %v173_v20, %s1310_s23 }
  0x1c   :  { %196 = vrot.lane.b32.xlu1 %v185_v22, %s1310_s23  ;;  %194 = vrot.lane.b32.xlu0 %v181_v23, %s1310_s23 }
  0x20   :  { %254 = vrot.lane.b32.xlu1 %v239_v25, %s1311_s24  ;;  %252 = vrot.lane.b32.xlu0 %v235_v26, %s1311_s24 }
  0x24   :  { %258 = vrot.lane.b32.xlu1 %v247_v27, %s1311_s24  ;;  %256 = vrot.lane.b32.xlu0 %v243_v28, %s1311_s24  ;;  %s1316_s24 = smov 126  }
  0x28   :  { %296 = vrot.lane.b32.xlu1 %v281_v30, %s1312_s25  ;;  %294 = vrot.lane.b32.xlu0 %v277_v31, %s1312_s25 }
  0x2c   :  { %336 = vrot.lane.b32.xlu1 %v319_v33, %s1313_s26  ;;  %298 = vrot.lane.b32.xlu0 %v285_v34, %s1312_s25 }
  0x30   :  { %340 = vrot.lane.b32.xlu1 %v327_v35, %s1313_s26  ;;  %338 = vrot.lane.b32.xlu0 %v323_v36, %s1313_s26 }
  0x34   :  { %342 = vrot.lane.b32.xlu1 %v331_v37, %s1313_s26  ;;  %300 = vrot.lane.b32.xlu0 %v289_v38, %s1312_s25  ;;  %s1317_s25 = smov 110   ;;  %s1318_s26 = smov 96  }
  0x38   :  { %380 = vrot.lane.b32.xlu1 %v1183_v39, %s1314_s9  ;;  %378 = vrot.lane.b32.xlu0 %v1182_v40, %s1314_s9 }
  0x3c   :  { %384 = vrot.lane.b32.xlu1 %v1185_v43, %s1314_s9  ;;  %382 = vrot.lane.b32.xlu0 %v1184_v44, %s1314_s9 }
  0x40   :  { %64 = vrot.lane.b32.xlu0 %v47_v45, %s1315_s22  ;;  %66 = vrot.lane.b32.xlu1 %v51_v46, %s1315_s22 }
  0x44   :  { %68 = vrot.lane.b32.xlu0 %v55_v55, %s1315_s22  ;;  %70 = vrot.lane.b32.xlu1 %v59_v57, %s1315_s22 }
  0x48   :  { %1217 = vrot.lane.b32.xlu0 %v1216_v61, %s1315_s22  ;;  %1212 = vrot.lane.b32.xlu1 %v1211_v62, %s1315_s22 }
  0x7a   :  { %v111_v63 = vpop.permute.xlu1 %110  ;;  %v107_v0 = vpop.permute.xlu0 %106 }
  0x7b   :  { %v123_v37 = vmul.f32 %v107_v0, %v1393_v7 }
  0x7e   :  { %v113_v1 = vpop.permute.xlu1 %112  ;;  %v109_v2 = vpop.permute.xlu0 %108 }
  0x7f   :  { %v127_v3 = vmul.f32 %v113_v1, %v1475_v52  ;;  %v117_v27 = vsel %vm114_vm0, %v111_v63, %v113_v1  ;;  %v115_v28 = vsel %vm114_vm0, %v107_v0, %v109_v2  ;;  %v116_v29 = vsel %vm114_vm0, %v109_v2, %v111_v63 }
  0x80   :  { %v126_v30 = vmul.f32 %v117_v27, %v1467_v48  ;;  %v124_v31 = vmul.f32 %v115_v28, %v1480_v53  ;;  %v125_v32 = vmul.f32 %v116_v29, %v1485_v54 }
  0x81   :  { %413 = vrot.lane.b32.xlu0 %v127_v3, %s1310_s23 }
  0x82   :  { %v151_v4 = vpop.permute.xlu1 %150  ;;  %v149_v5 = vpop.permute.xlu0 %148  ;;  %v1221_v41 = vpack.i.bf16 %v125_v32, %v124_v31  ;;  %v1226_v42 = vpack.i.bf16 %v123_v37, %v126_v30 }
  0x83   :  { %v157_v40 = vsel %vm156_vm1, %v149_v5, %v151_v4  ;;  %v165_v50 = vmul.f32 %v149_v5, %v1393_v7 }
  0x84   :  { %v166_v51 = vmul.f32 %v157_v40, %v1480_v53 }
  0x86   :  { %v155_v6 = vpop.permute.xlu1 %154  ;;  %v153_v8 = vpop.permute.xlu0 %152 }
  0x87   :  { %v169_v9 = vmul.f32 %v155_v6, %v1475_v52  ;;  %v158_v38 = vsel %vm156_vm1, %v151_v4, %v153_v8  ;;  %v159_v39 = vsel %vm156_vm1, %v153_v8, %v155_v6 }
  0x88   :  { %v167_v45 = vmul.f32 %v158_v38, %v1485_v54  ;;  %v168_v46 = vmul.f32 %v159_v39, %v1467_v48 }
  0x89   :  { %437 = vrot.lane.b32.xlu1 %v169_v9, %s1316_s24 }
  0x8a   :  { %v193_v10 = vpop.permute.xlu1 %192  ;;  %v191_v11 = vpop.permute.xlu0 %190  ;;  %v1231_v61 = vpack.i.bf16 %v167_v45, %v166_v51  ;;  %v1236_v62 = vpack.i.bf16 %v165_v50, %v168_v46 }
  0x8b   :  { %v199_v55 = vsel %vm198_vm2, %v191_v11, %v193_v10  ;;  %v207_v60 = vmul.f32 %v191_v11, %v1393_v7 }
  0x8c   :  { %v208_v63 = vmul.f32 %v199_v55, %v1480_v53 }
  0x8e   :  { %v197_v12 = vpop.permute.xlu1 %196  ;;  %v195_v13 = vpop.permute.xlu0 %194 }
  0x8f   :  { %v211_v14 = vmul.f32 %v197_v12, %v1475_v52  ;;  %v200_v47 = vsel %vm198_vm2, %v193_v10, %v195_v13  ;;  %v201_v49 = vsel %vm198_vm2, %v195_v13, %v197_v12 }
  0x90   :  { %v209_v56 = vmul.f32 %v200_v47, %v1485_v54  ;;  %v210_v57 = vmul.f32 %v201_v49, %v1467_v48 }
  0x91   :  { %462 = vrot.lane.b32.xlu0 %v211_v14, %s1308_s17 }
  0x92   :  { %v255_v15 = vpop.permute.xlu1 %254  ;;  %v253_v16 = vpop.permute.xlu0 %252  ;;  %v1241_v4 = vpack.i.bf16 %v209_v56, %v208_v63  ;;  %v1246_v5 = vpack.i.bf16 %v207_v60, %v210_v57 }
  0x93   :  { %v261_v0 = vsel %vm260_vm3, %v253_v16, %v255_v15  ;;  %v269_v3 = vmul.f32 %v253_v16, %v1480_v53 }
  0x94   :  { %v270_v9 = vmul.f32 %v261_v0, %v1485_v54 }
  0x96   :  { %v259_v17 = vpop.permute.xlu1 %258  ;;  %v257_v18 = vpop.permute.xlu0 %256 }
  0x97   :  { %v273_v19 = vmul.f32 %v259_v17, %v1417_v21  ;;  %v262_v1 = vsel %vm260_vm3, %v255_v15, %v257_v18  ;;  %v263_v2 = vsel %vm260_vm3, %v257_v18, %v259_v17 }
  0x98   :  { %v271_v10 = vmul.f32 %v262_v1, %v1467_v48  ;;  %v272_v11 = vmul.f32 %v263_v2, %v1475_v52 }
  0x99   :  { %506 = vrot.lane.b32.xlu1 %v273_v19, %s1317_s25  ;;  %v1251_v19 = vpack.i.bf16 %v270_v9, %v269_v3 }
  0x9a   :  { %v1501_v20 = vpop.permute.xlu1 %296  ;;  %v1503_v22 = vpop.permute.xlu0 %294  ;;  %v1256_v29 = vpack.i.bf16 %v272_v11, %v271_v10 }
  0x9b   :  { %v303_v12 = vsel %vm302_vm4, %v1503_v22, %v1501_v20  ;;  %v311_v14 = vmul.f32 %v1503_v22, %v1480_v53 }
  0x9c   :  { %v312_v15 = vmul.f32 %v303_v12, %v1485_v54 }
  0x9e   :  { %v1505_v23 = vpop.permute.xlu1 %336  ;;  %v1507_v24 = vpop.permute.xlu0 %298 }
  0x9f   :  { %v304_v16 = vsel %vm302_vm4, %v1501_v20, %v1507_v24  ;;  %v353_v38 = vmul.f32 %v1505_v23, %v1480_v53 }
  0xa0   :  { %v313_v30 = vmul.f32 %v304_v16, %v1467_v48 }
  0xa2   :  { %v1509_v25 = vpop.permute.xlu1 %340  ;;  %v1511_v26 = vpop.permute.xlu0 %338 }
  0xa3   :  { %v345_v27 = vsel %vm344_vm5, %v1505_v23, %v1511_v26  ;;  %v346_v20 = vsel %vm344_vm5, %v1511_v26, %v1509_v25 }
  0xa4   :  { %v354_v31 = vmul.f32 %v345_v27, %v1485_v54  ;;  %v355_v39 = vmul.f32 %v346_v20, %v1467_v48 }
  0xa6   :  { %v1519_v33 = vpop.permute.xlu1 %342  ;;  %v301_v34 = vpop.permute.xlu0 %300  ;;  %v1271_v47 = vpack.i.bf16 %v354_v31, %v353_v38 }
  0xa7   :  { %v357_v35 = vmul.f32 %v1519_v33, %v1417_v21  ;;  %v315_v36 = vmul.f32 %v301_v34, %v1417_v21  ;;  %v305_v13 = vsel %vm302_vm4, %v1507_v24, %v301_v34  ;;  %v347_v22 = vsel %vm344_vm5, %v1509_v25, %v1519_v33 }
  0xa8   :  { %v314_v28 = vmul.f32 %v305_v13, %v1475_v52  ;;  %v1261_v24 = vpack.i.bf16 %v312_v15, %v311_v14 }
  0xa9   :  { %531 = vrot.lane.b32.xlu0 %v315_v36, %s1318_s26  ;;  %556 = vrot.lane.b32.xlu1 %v357_v35, %s1319_s27  ;;  %v356_v36 = vmul.f32 %v347_v22, %v1475_v52 }
  0xaa   :  { %v1527_v43 = vpop.permute.xlu1 %380  ;;  %v1529_v44 = vpop.permute.xlu0 %378  ;;  %v1266_v25 = vpack.i.bf16 %v314_v28, %v313_v30 }
  0xab   :  { %v387_v40 = vsel %vm386_vm6, %v1529_v44, %v1527_v43  ;;  %v395_v45 = vmul.f32 %v1529_v44, %v1480_v53  ;;  %v1281_v46 = vpack.i.bf16 %v356_v36, %v355_v39 }
  0xad   :  { %1222 = vrot.lane.b32.xlu1 %v1221_v41, %s1310_s23  ;;  %1227 = vrot.lane.b32.xlu0 %v1226_v42, %s1310_s23 }
  0xae   :  { %v1542_v58 = vpop.permute.xlu1 %384  ;;  %v383_v59 = vpop.permute.xlu0 %382 }
  0xaf   :  { %v388_v32 = vsel %vm386_vm6, %v1527_v43, %v383_v59  ;;  %v389_v34 = vsel %vm386_vm6, %v383_v59, %v1542_v58  ;;  %v396_v43 = vmul.f32 %v387_v40, %v1485_v54  ;;  %v399_v51 = vmul.f32 %v1542_v58, %v1417_v21 }
  0xb0   :  { %v397_v41 = vmul.f32 %v388_v32, %v1467_v48  ;;  %v398_v42 = vmul.f32 %v389_v34, %v1475_v52 }
  0xb1   :  { %1232 = vrot.lane.b32.xlu1 %v1231_v61, %s1316_s24  ;;  %1237 = vrot.lane.b32.xlu0 %v1236_v62, %s1316_s24  ;;  %v1276_v50 = vpack.i.bf16 %v396_v43, %v395_v45 }
  0xb2   :  { %v1549_v6 = vpop.permute.xlu0 %64  ;;  %v1551_v8 = vpop.permute.xlu1 %66  ;;  %v1286_v49 = vpack.i.bf16 %v398_v42, %v397_v41 }
  0xb5   :  { %1242 = vrot.lane.b32.xlu1 %v1241_v4, %s1308_s17  ;;  %1247 = vrot.lane.b32.xlu0 %v1246_v5, %s1308_s17  ;;  %s1320_s17 = smov 94  }
  0xb6   :  { %v1569_v17 = vpop.permute.xlu0 %68  ;;  %v1571_v18 = vpop.permute.xlu1 %70 }
  0xb7   :  { %v85_v36 = vmul.f32 %v1571_v18, %v1475_v52  ;;  %v74_v52 = vsel %vm72_vm7, %v1551_v8, %v1569_v17 }
  0xb9   :  { %1252 = vrot.lane.b32.xlu1 %v1251_v19, %s1317_s25  ;;  %1257 = vrot.lane.b32.xlu0 %v1256_v29, %s1317_s25 }
  0xba   :  { %v1591_v33 = vpop.permute.xlu0 %1217  ;;  %v1593_v35 = vpop.permute.xlu1 %1212 }
  0xbb   :  { %v1219_v26 = vunpack.i.l.bf16 %v1591_v33  ;;  %v1215_v37 = vunpack.i.h.bf16 %v1593_v35  ;;  %v1220_v4 = vunpack.i.h.bf16 %v1591_v33 }
  0xbd   :  { %1267 = vrot.lane.b32.xlu1 %v1266_v25, %s1318_s26  ;;  %1262 = vrot.lane.b32.xlu0 %v1261_v24, %s1318_s26  ;;  %v1613_v23 = vsel %vm72_vm7, %v1215_v37, %v1219_v26 }
  0xc1   :  { %1282 = vrot.lane.b32.xlu1 %v1281_v46, %s1319_s27  ;;  %1272 = vrot.lane.b32.xlu0 %v1271_v47, %s1319_s27 }
  0xc5   :  { %1287 = vrot.lane.b32.xlu1 %v1286_v49, %s1320_s17  ;;  %1277 = vrot.lane.b32.xlu0 %v1276_v50, %s1320_s17  ;;  %v1214_v49 = vunpack.i.l.bf16 %v1593_v35 }
  0xc9   :  { %581 = vrot.lane.b32.xlu0 %v399_v51, %s1320_s17  ;;  %v73_v51 = vsel %vm72_vm7, %v1549_v6, %v1551_v8 }
  0xf3   :  { %v1622_v55 = vpop.permute.xlu0 %413 }
  0xf4   :  { %v597_v45 = vpack.c.bf16 %v1622_v55, %v85_v36 }
  0xfb   :  { %v1624_v44 = vpop.permute.xlu1 %437 }
 0x103   :  { %v1626_v56 = vpop.permute.xlu0 %462 }
 0x104   :  { %v602_v38 = vpack.c.bf16 %v1626_v56, %v1624_v44 }
 0x10b   :  { %v507_v57 = vpop.permute.xlu1 %506 }
 0x11b   :  { %v532_v59 = vpop.permute.xlu0 %531  ;;  %v557_v60 = vpop.permute.xlu1 %556 }
 0x11f   :  { %v1628_v61 = vpop.permute.xlu1 %1222  ;;  %v1630_v62 = vpop.permute.xlu0 %1227 }
 0x120   :  { %v1225_v40 = vunpack.i.h.bf16 %v1628_v61  ;;  %v1229_v41 = vunpack.i.l.bf16 %v1630_v62  ;;  %v1224_v46 = vunpack.i.l.bf16 %v1628_v61  ;;  %v1230_v61 = vunpack.i.h.bf16 %v1630_v62 }
 0x122   :  { %v417_v50 = vsel %vm198_vm2, %v1225_v40, %v1229_v41 }
 0x123   :  { %v1632_v63 = vpop.permute.xlu1 %1232  ;;  %v1634_v0 = vpop.permute.xlu0 %1237 }
 0x127   :  { %v1636_v1 = vpop.permute.xlu1 %1242  ;;  %v1638_v21 = vpop.permute.xlu0 %1247 }
 0x128   :  { %v1244_v8 = vunpack.i.l.bf16 %v1636_v1 }
 0x12b   :  { %v1640_v58 = vpop.permute.xlu1 %1252  ;;  %v1642_v2 = vpop.permute.xlu0 %1257 }
 0x12c   :  { %v1260_v3 = vunpack.i.h.bf16 %v1642_v2  ;;  %v1254_v43 = vunpack.i.l.bf16 %v1640_v58 }
 0x12e   :  { %v512_v10 = vsel %vm508_vm8, %v1260_v3, %v507_v57  ;;  %v83_v57 = vmul.f32 %v74_v52, %v1485_v54  ;;  %v418_v54 = vsel %vm198_vm2, %v1229_v41, %v1622_v55  ;;  %v1250_v55 = vunpack.i.h.bf16 %v1638_v21 }
 0x12f   :  { %v1646_v5 = vpop.permute.xlu1 %1267  ;;  %v1648_v9 = vpop.permute.xlu0 %1262  ;;  %v1655_v11 = vpack.c.bf16 %v512_v10, %v1220_v4 }
 0x130   :  { %v1270_v12 = vunpack.i.h.bf16 %v1646_v5  ;;  %v1264_v42 = vunpack.i.l.bf16 %v1648_v9  ;;  %v595_v10 = vpack.c.bf16 %v417_v50, %v83_v57 }
 0x132   :  { %v1666_v16 = vsel %vm533_vm9, %v1270_v12, %v532_v59  ;;  %v75_v59 = vsel %vm72_vm7, %v1569_v17, %v1571_v18  ;;  %v1235_v17 = vunpack.i.h.bf16 %v1632_v63  ;;  %v1234_v18 = vunpack.i.l.bf16 %v1632_v63 }
 0x133   :  { %v1658_v13 = vpop.permute.xlu1 %1282  ;;  %v1660_v14 = vpop.permute.xlu0 %1272  ;;  %v1240_v63 = vunpack.i.h.bf16 %v1634_v0 }
 0x134   :  { %v1285_v15 = vunpack.i.h.bf16 %v1658_v13  ;;  %v1274_v39 = vunpack.i.l.bf16 %v1660_v14 }
 0x136   :  { %v1671_v19 = vsel %vm558_vm10, %v1285_v15, %v557_v60  ;;  %v608_v47 = vpack.c.bf16 %v1274_v39, %v1264_v42  ;;  %v603_v60 = vpack.c.bf16 %v1254_v43, %v1214_v49 }
 0x137   :  { %v1673_v27 = vpop.permute.xlu1 %1287  ;;  %v1278_v28 = vpop.permute.xlu0 %1277  ;;  %v612_v29 = vpack.c.bf16 %v1671_v19, %v1666_v16  ;;  %v622_v16 = vld [vmem:[%s1992_s3] sm:$0xff]  ;;  %v624_v19 = vld [vmem:[%s1992_s3 + $0x10] sm:$0xff] }
 0x138   :  { %v1289_v22 = vunpack.i.l.bf16 %v1673_v27  ;;  %v1280_v30 = vunpack.i.h.bf16 %v1278_v28  ;;  %v1279_v20 = vunpack.i.l.bf16 %v1278_v28  ;;  %v416_v28 = vsel %vm198_vm2, %v1224_v46, %v1225_v40 }
 0x13a   :  { %v613_v24 = vpack.c.bf16 %v1279_v20, %v1279_v20  ;;  %v584_v31 = vsel %vm583_vm11, %v1279_v20, %v1280_v30  ;;  %v585_v34 = vsel %vm583_vm11, %v1280_v30, %v1289_v22  ;;  %v82_v30 = vmul.f32 %v73_v51, %v1480_v53 }
 0x13b   :  { %v614_v32 = vpack.c.bf16 %v584_v31, %v584_v31  ;;  %v615_v25 = vpack.c.bf16 %v585_v34, %v585_v34  ;;  %v1245_v20 = vunpack.i.h.bf16 %v1636_v1  ;;  %v1249_v53 = vunpack.i.l.bf16 %v1638_v21 }
 0x13c   :  { %721 = vrot.lane.b32.xlu1 %v613_v24, %s1314_s9  ;;  %v84_v24 = vmul.f32 %v75_v59, %v1467_v48  ;;  %v594_v62 = vpack.c.bf16 %v416_v28, %v82_v30  ;;  %v81_v1 = vmul.f32 %v1549_v6, %v1393_v7  ;;  %v1239_v34 = vunpack.i.l.bf16 %v1634_v0 }
 0x13d   :  { %723 = vrot.lane.b32.xlu0 %v614_v32, %s1314_s9  ;;  %v415_v32 = vsel %vm198_vm2, %v1230_v61, %v1224_v46  ;;  %v465_v48 = vsel %vm114_vm0, %v1244_v8, %v1245_v20  ;;  %v466_v40 = vsel %vm114_vm0, %v1245_v20, %v1249_v53  ;;  %v1255_v7 = vunpack.i.h.bf16 %v1640_v58 }
 0x13e   :  { %v596_v31 = vpack.c.bf16 %v418_v54, %v84_v24  ;;  %v593_v36 = vpack.c.bf16 %v415_v32, %v81_v1  ;;  %v1259_v6 = vunpack.i.l.bf16 %v1642_v2  ;;  %v464_v21 = vsel %vm114_vm0, %v1250_v55, %v1244_v8 }
 0x13f   :  { %v442_v41 = vsel %vm439_vm12, %v1235_v17, %v1239_v34  ;;  %v440_v0 = vsel %vm439_vm12, %v1240_v63, %v1234_v18  ;;  %v467_v46 = vsel %vm114_vm0, %v1249_v53, %v1626_v56  ;;  %v509_v57 = vsel %vm508_vm8, %v1254_v43, %v1255_v7 }
 0x140   :  { %725 = vrot.lane.b32.xlu1 %v615_v25, %s1314_s9  ;;  %v441_v25 = vsel %vm439_vm12, %v1234_v18, %v1235_v17  ;;  %v600_v52 = vpack.c.bf16 %v466_v40, %v442_v41  ;;  %v510_v58 = vsel %vm508_vm8, %v1255_v7, %v1259_v6  ;;  %v1275_v59 = vunpack.i.h.bf16 %v1660_v14 }
 0x141   :  { %699 = vrot.lane.b32.xlu0 %v602_v38, %s1314_s9  ;;  %v599_v38 = vpack.c.bf16 %v465_v48, %v441_v25  ;;  %v605_v51 = vpack.c.bf16 %v510_v58, %v1613_v23  ;;  %v511_v56 = vsel %vm508_vm8, %v1259_v6, %v1260_v3  ;;  %v487_v23 = vsel %vm72_vm7, %v1219_v26, %v1220_v4 }
 0x142   :  { %v1284_v43 = vunpack.i.l.bf16 %v1658_v13  ;;  %v606_v2 = vpack.c.bf16 %v511_v56, %v487_v23  ;;  %v559_v35 = vsel %vm558_vm10, %v1274_v39, %v1275_v59  ;;  %v1290_v4 = vunpack.i.h.bf16 %v1673_v27 }
 0x144   :  { %689 = vrot.lane.b32.xlu1 %v597_v45, %s1314_s9  ;;  %v598_v45 = vpack.c.bf16 %v464_v21, %v440_v0  ;;  %v560_v26 = vsel %vm558_vm10, %v1275_v59, %v1284_v43  ;;  %v561_v39 = vsel %vm558_vm10, %v1284_v43, %v1285_v15 }
 0x145   :  { %711 = vrot.lane.b32.xlu0 %v608_v47, %s1314_s9  ;;  %v443_v47 = vsel %vm439_vm12, %v1239_v34, %v1624_v44  ;;  %v1265_v44 = vunpack.i.h.bf16 %v1648_v9 }
 0x146   :  { %v601_v50 = vpack.c.bf16 %v467_v46, %v443_v47 }
 0x147   :  { %v534_v3 = vsel %vm533_vm9, %v1264_v42, %v1265_v44  ;;  %v582_v42 = vpop.permute.xlu0 %581 }
 0x148   :  { %701 = vrot.lane.b32.xlu1 %v603_v60, %s1314_s9  ;;  %v485_v60 = vsel %vm72_vm7, %v1214_v49, %v1215_v37  ;;  %v1269_v37 = vunpack.i.l.bf16 %v1646_v5  ;;  %v609_v33 = vpack.c.bf16 %v559_v35, %v534_v3  ;;  %v1321_v49 = vmov 0   ;;  %v623_v5 = vld [vmem:[%s1992_s3 + $0x8] sm:$0xff]  ;;  %v1293_v35 = vld [vmem:[%s1991_s2] sm:$0xff]  }
 0x149   :  { %685 = vrot.lane.b32.xlu0 %v595_v10, %s1314_s9  ;;  %v604_v61 = vpack.c.bf16 %v509_v57, %v485_v60  ;;  %820 = vmatprep.mubr.bf16.mxu0 %v1321_v49  ;;  %v587_v13 = vsel %vm583_vm11, %v1290_v4, %v582_v42 }
 0x14a   :  { %v535_v14 = vsel %vm533_vm9, %v1265_v44, %v1269_v37  ;;  %873 = vmatprep.mubr.bf16.mxu1 %v1321_v49  ;;  %1291 = vset.pattern.permute.xlu0 %v1321_v49  ;;  %v536_v10 = vsel %vm533_vm9, %v1269_v37, %v1270_v12  ;;  %v617_v27 = vpack.c.bf16 %v587_v13, %v587_v13  ;;  %v625_v12 = vld [vmem:[%s1992_s3 + $0x18] sm:$0xff] }
 0x14b   :  { %v610_v9 = vpack.c.bf16 %v560_v26, %v535_v14  ;;  %1292 = vset.pattern.permute.xlu1 %v1321_v49  ;;  %v611_v28 = vpack.c.bf16 %v561_v39, %v536_v10 }
 0x14c   :  { %683 = vrot.lane.b32.xlu1 %v594_v62, %s1314_s9 }
 0x14d   :  { %687 = vrot.lane.b32.xlu0 %v596_v31, %s1314_s9 }
 0x150   :  { %681 = vrot.lane.b32.xlu1 %v593_v36, %s1314_s9 }
 0x151   :  { %693 = vrot.lane.b32.xlu0 %v599_v38, %s1314_s9 }
 0x154   :  { %695 = vrot.lane.b32.xlu1 %v600_v52, %s1314_s9 }
 0x155   :  { %691 = vrot.lane.b32.xlu0 %v598_v45, %s1314_s9 }
 0x158   :  { %697 = vrot.lane.b32.xlu1 %v601_v50, %s1314_s9 }
 0x159   :  { %705 = vrot.lane.b32.xlu0 %v605_v51, %s1314_s9 }
 0x15c   :  { %703 = vrot.lane.b32.xlu1 %v604_v61, %s1314_s9 }
 0x15d   :  { %707 = vrot.lane.b32.xlu0 %v606_v2, %s1314_s9 }
 0x160   :  { %709 = vrot.lane.b32.xlu1 %v1655_v11, %s1314_s9  ;;  %v586_v11 = vsel %vm583_vm11, %v1289_v22, %v1290_v4  ;;  %v1294_v4 = vld [vmem:[%s1991_s2 + $0x8] sm:$0xff]  }
 0x161   :  { %713 = vrot.lane.b32.xlu0 %v609_v33, %s1314_s9  ;;  %v616_v15 = vpack.c.bf16 %v586_v11, %v586_v11 }
 0x164   :  { %715 = vrot.lane.b32.xlu1 %v610_v9, %s1314_s9 }
 0x165   :  { %719 = vrot.lane.b32.xlu0 %v612_v29, %s1314_s9 }
 0x168   :  { %717 = vrot.lane.b32.xlu1 %v611_v28, %s1314_s9 }
 0x169   :  { %727 = vrot.lane.b32.xlu0 %v616_v15, %s1314_s9 }
 0x16c   :  { %729 = vrot.lane.b32.xlu1 %v617_v27, %s1314_s9 }
 0x16d   :  { %628 = vperm.xlu0 %1291, %v622_v16  }
 0x170   :  { %633 = vperm.xlu1 %1292, %v623_v5  }
 0x171   :  { %643 = vperm.xlu0 %1291, %v625_v12  }
 0x174   :  { %638 = vperm.xlu1 %1292, %v624_v19  }
 0x1ae   :  { %v722_v29 = vpop.permute.xlu1 %721 }
 0x1af   :  { %v724_v22 = vpop.permute.xlu0 %723 }
 0x1b0   :  { %v748_v56 = vsel %vm386_vm6, %v722_v29, %v724_v22 }
 0x1b1   :  { %v777_v2 = vsel %vm775_vm13, %v748_v56, 0 }
 0x1b2   :  { %v726_v30 = vpop.permute.xlu1 %725 }
 0x1b3   :  { %v700_v20 = vpop.permute.xlu0 %699  ;;  %v749_v60 = vsel %vm386_vm6, %v724_v22, %v726_v30 }
 0x1b6   :  { %v690_v8 = vpop.permute.xlu1 %689 }
 0x1b7   :  { %v712_v54 = vpop.permute.xlu0 %711 }
 0x1ba   :  { %v702_v24 = vpop.permute.xlu1 %701 }
 0x1bb   :  { %v686_v17 = vpop.permute.xlu0 %685 }
 0x1be   :  { %v684_v18 = vpop.permute.xlu1 %683 }
 0x1bf   :  { %v688_v62 = vpop.permute.xlu0 %687  ;;  %v733_v53 = vsel %vm386_vm6, %v684_v18, %v686_v17 }
 0x1c0   :  { %788 = vmatprep.subr.bf16.mxu0 %v733_v53  ;;  %v735_v31 = vsel %vm386_vm6, %v688_v62, %v690_v8  ;;  %v734_v32 = vsel %vm386_vm6, %v686_v17, %v688_v62 }
 0x1c1   :  { %841 = vmatprep.subr.bf16.mxu1 %v735_v31 }
 0x1c2   :  { %842 = vmatpush1.bf16.msra.mxu1 %v734_v32  ;;  %v682_v1 = vpop.permute.xlu1 %681 }
 0x1c3   :  { %v694_v55 = vpop.permute.xlu0 %693  ;;  %v732_v48 = vsel %vm386_vm6, %v682_v1, %v684_v18 }
 0x1c4   :  { %789 = vmatpush1.bf16.msra.mxu0 %v732_v48 }
 0x1c6   :  { %v696_v34 = vpop.permute.xlu1 %695 }
 0x1c7   :  { %v692_v63 = vpop.permute.xlu0 %691  ;;  %v737_v36 = vsel %vm386_vm6, %v694_v55, %v696_v34 }
 0x1c8   :  { %790 = vmatprep.subr.bf16.mxu0 %v737_v36  ;;  %v736_v25 = vsel %vm386_vm6, %v692_v63, %v694_v55 }
 0x1c9   :  { %791 = vmatpush1.bf16.msra.mxu0 %v736_v25 }
 0x1ca   :  { %v698_v38 = vpop.permute.xlu1 %697 }
 0x1cb   :  { %v706_v40 = vpop.permute.xlu0 %705  ;;  %v739_v7 = vsel %vm386_vm6, %v698_v38, %v700_v20  ;;  %v738_v6 = vsel %vm386_vm6, %v696_v34, %v698_v38 }
 0x1cc   :  { %843 = vmatprep.subr.bf16.mxu1 %v739_v7 }
 0x1cd   :  { %844 = vmatpush1.bf16.msra.mxu1 %v738_v6 }
 0x1ce   :  { %v704_v21 = vpop.permute.xlu1 %703 }
 0x1cf   :  { %v708_v41 = vpop.permute.xlu0 %707  ;;  %v741_v52 = vsel %vm386_vm6, %v704_v21, %v706_v40  ;;  %v740_v0 = vsel %vm386_vm6, %v702_v24, %v704_v21 }
 0x1d0   :  { %792 = vmatprep.subr.bf16.mxu0 %v741_v52  ;;  %v742_v47 = vsel %vm386_vm6, %v706_v40, %v708_v41 }
 0x1d1   :  { %793 = vmatpush1.bf16.msra.mxu0 %v740_v0 }
 0x1d2   :  { %v710_v45 = vpop.permute.xlu1 %709 }
 0x1d3   :  { %v714_v46 = vpop.permute.xlu0 %713  ;;  %v743_v58 = vsel %vm386_vm6, %v708_v41, %v710_v45 }
 0x1d4   :  { %845 = vmatprep.subr.bf16.mxu1 %v743_v58  ;;  %v744_v59 = vsel %vm386_vm6, %v712_v54, %v714_v46 }
 0x1d5   :  { %846 = vmatpush1.bf16.msra.mxu1 %v742_v47 }
 0x1d6   :  { %v716_v50 = vpop.permute.xlu1 %715 }
 0x1d7   :  { %v720_v51 = vpop.permute.xlu0 %719  ;;  %v745_v57 = vsel %vm386_vm6, %v714_v46, %v716_v50 }
 0x1d8   :  { %794 = vmatprep.subr.bf16.mxu0 %v745_v57 }
 0x1d9   :  { %795 = vmatpush1.bf16.msra.mxu0 %v744_v59 }
 0x1da   :  { %1188 = vmatprep.subr.msk.bf16.mxu0 %vm775_vm13, %v749_v60  ;;  %v718_v44 = vpop.permute.xlu1 %717 }
 0x1db   :  { %v728_v61 = vpop.permute.xlu0 %727  ;;  %v747_v23 = vsel %vm386_vm6, %v718_v44, %v720_v51  ;;  %v746_v43 = vsel %vm386_vm6, %v716_v50, %v718_v44 }
 0x1dc   :  { %847 = vmatprep.subr.bf16.mxu1 %v747_v23  ;;  %v750_v37 = vsel %vm386_vm6, %v726_v30, %v728_v61 }
 0x1dd   :  { %797 = vmatpush1.bf16.msra.mxu0 %v777_v2  ;;  %848 = vmatpush1.bf16.msra.mxu1 %v746_v43  ;;  %v783_v26 = vsel %vm775_vm13, %v750_v37, 0 }
 0x1de   :  { %v730_v3 = vpop.permute.xlu1 %729 }
 0x1df   :  { %v751_v33 = vsel %vm386_vm6, %v728_v61, %v730_v3 }
 0x1e0   :  { %1189 = vmatmul.mubr.msk.bf16.vlgmr.msra.gmra.mrb[0].mxu0 %vm768_vm14, %v1293_v35  ;;  %1191 = vmatprep.subr.msk.bf16.mxu1 %vm775_vm13, %v751_v33 }
 0x1e1   :  { %850 = vmatpush1.bf16.msra.mxu1 %v783_v26  ;;  %830 = vmatprep.mubr.bf16.mxu0 %v1321_v49 }
 0x1e4   :  { %1192 = vmatmul.mubr.msk.bf16.vlgmr.msra.gmra.mrb[0].mxu1 %vm768_vm14, %v1293_v35 }
 0x1e5   :  { %883 = vmatprep.mubr.bf16.mxu1 %v1321_v49 }
 0x1e8   :  { %1190 = vmatmul.mubr.msk.bf16.gmra.mrb[4].mxu0 %vm768_vm14, %v1294_v4 }
 0x1e9   :  { %1118 = vmatprep.mubr.bf16.mxu0 %v1321_v49 }
 0x1ec   :  { %1193 = vmatmul.mubr.msk.bf16.gmra.mrb[4].mxu1 %vm768_vm14, %v1294_v4  ;;  %v629_v14 = vpop.permute.xlu0 %628 }
 0x1ed   :  { %1159 = vmatprep.mubr.bf16.mxu1 %v1321_v49 }
 0x1ef   :  { %v634_v39 = vpop.permute.xlu1 %633 }
 0x1f0   :  { %v644_v32 = vpop.permute.xlu0 %643 }
 0x1f3   :  { %v639_v20 = vpop.permute.xlu1 %638 }
 0x2b3   :  { %v822_v9 = vpop.f32.mrb[0].mxu0 }
 0x2b4   :  { %v823_v42 = vadd.f32 %v822_v9, %v629_v14  ;;  %v824_v11 = vpop.f32.mrb[1].mxu0 }
 0x2b5   :  { %v825_v10 = vadd.f32 %v824_v11, %v629_v14  ;;  %v826_v28 = vpop.f32.mrb[2].mxu0 }
 0x2b6   :  { %v827_v13 = vadd.f32 %v826_v28, %v634_v39  ;;  %v828_v15 = vpop.f32.mrb[3].mxu0 }
 0x2b7   :  { %v894_v27 = vadd.f32 %v825_v10, %v823_v42  ;;  %v829_v16 = vadd.f32 %v828_v15, %v634_v39  ;;  %v875_v5 = vpop.f32.mrb[0].mxu1 }
 0x2b8   :  { %v876_v12 = vadd.f32 %v875_v5, %v629_v14  ;;  %v877_v19 = vpop.f32.mrb[1].mxu1 }
 0x2b9   :  { %v899_v29 = vadd.f32 %v829_v16, %v827_v13  ;;  %v878_v22 = vadd.f32 %v877_v19, %v629_v14  ;;  %v879_v30 = vpop.f32.mrb[2].mxu1 }
 0x2ba   :  { %v895_v8 = vadd.f32 %v894_v27, %v876_v12  ;;  %v880_v49 = vadd.f32 %v879_v30, %v634_v39  ;;  %v881_v54 = vpop.f32.mrb[3].mxu1 }
 0x2bb   :  { %v882_v24 = vadd.f32 %v881_v54, %v634_v39  ;;  %v832_v17 = vpop.f32.mrb[4].mxu0 }
 0x2bc   :  { %v900_v18 = vadd.f32 %v899_v29, %v880_v49  ;;  %v833_v62 = vadd.f32 %v832_v17, %v639_v20  ;;  %v834_v53 = vpop.f32.mrb[5].mxu0  ;;  %v896_v31 = vadd.f32 %v895_v8, %v878_v22 }
 0x2bd   :  { %v835_v1 = vadd.f32 %v834_v53, %v639_v20  ;;  %v836_v55 = vpop.f32.mrb[6].mxu0 }
 0x2be   :  { %v837_v48 = vadd.f32 %v836_v55, %v644_v32  ;;  %v838_v34 = vpop.f32.mrb[7].mxu0  ;;  %897 = vadd.xlane.f32.xlu1 %v896_v31  ;;  %v901_v63 = vadd.f32 %v900_v18, %v882_v24 }
 0x2bf   :  { %v904_v36 = vadd.f32 %v835_v1, %v833_v62  ;;  %v839_v25 = vadd.f32 %v838_v34, %v644_v32  ;;  %v885_v38 = vpop.f32.mrb[4].mxu1 }
 0x2c0   :  { %v886_v40 = vadd.f32 %v885_v38, %v639_v20  ;;  %v887_v7 = vpop.f32.mrb[5].mxu1  ;;  %902 = vadd.xlane.f32.xlu0 %v901_v63 }
 0x2c1   :  { %v909_v6 = vadd.f32 %v839_v25, %v837_v48  ;;  %v888_v21 = vadd.f32 %v887_v7, %v639_v20  ;;  %v889_v41 = vpop.f32.mrb[6].mxu1  ;;  %v1028_v7 = vld [vmem:[%s1993_s5 + $0x8] sm:$0xff] }
 0x2c2   :  { %v905_v52 = vadd.f32 %v904_v36, %v886_v40  ;;  %v890_v0 = vadd.f32 %v889_v41, %v644_v32  ;;  %v891_v45 = vpop.f32.mrb[7].mxu1 }
 0x2c3   :  { %v892_v46 = vadd.f32 %v891_v45, %v644_v32 }
 0x2c4   :  { %v910_v58 = vadd.f32 %v909_v6, %v890_v0  ;;  %v906_v47 = vadd.f32 %v905_v52, %v888_v21 }
 0x2c6   :  { %907 = vadd.xlane.f32.xlu0 %v906_v47  ;;  %v911_v50 = vadd.f32 %v910_v58, %v892_v46 }
 0x2c8   :  { %912 = vadd.xlane.f32.xlu1 %v911_v50 }
 0x34b   :  { %v898_v51 = vpop.xlane.xlu1 %897 }
 0x34c   :  { %v915_v57 = vmul.f32 0.001953125, %v898_v51 }
 0x34d   :  { %v903_v59 = vpop.xlane.xlu0 %902 }
 0x34e   :  { %v1854_v56 = vsub.f32 %v823_v42, %v915_v57  ;;  %v1856_v60 = vsub.f32 %v825_v10, %v915_v57  ;;  %v916_v44 = vmul.f32 0.001953125, %v903_v59  ;;  %v1858_v61 = vsub.f32 %v876_v12, %v915_v57  ;;  %v975_v59 = vld [vmem:[%s1994_s4] sm:$0xff] }
 0x34f   :  { %v1860_v23 = vsub.f32 %v878_v22, %v915_v57 }
 0x350   :  { %v1862_v43 = vsub.f32 %v827_v13, %v916_v44  ;;  %v1864_v2 = vsub.f32 %v829_v16, %v916_v44  ;;  %v935_v35 = vmul.f32 %v1854_v56, %v1854_v56  ;;  %v936_v37 = vmul.f32 %v1856_v60, %v1856_v60 }
 0x351   :  { %v1870_v3 = vsub.f32 %v880_v49, %v916_v44  ;;  %v937_v33 = vmul.f32 %v1858_v61, %v1858_v61  ;;  %v1878_v39 = vsub.f32 %v882_v24, %v916_v44  ;;  %v938_v11 = vmul.f32 %v1860_v23, %v1860_v23 }
 0x352   :  { %v951_v26 = vadd.f32 %v936_v37, %v935_v35  ;;  %v939_v4 = vmul.f32 %v1862_v43, %v1862_v43  ;;  %v940_v14 = vmul.f32 %v1864_v2, %v1864_v2  ;;  %v976_v37 = vld [vmem:[%s1994_s4 + $0x8] sm:$0xff] }
 0x353   :  { %v908_v9 = vpop.xlane.xlu0 %907  ;;  %v941_v15 = vmul.f32 %v1870_v3, %v1870_v3  ;;  %v942_v19 = vmul.f32 %v1878_v39, %v1878_v39 }
 0x354   :  { %v917_v42 = vmul.f32 0.001953125, %v908_v9  ;;  %v952_v10 = vadd.f32 %v951_v26, %v937_v33  ;;  %v956_v28 = vadd.f32 %v940_v14, %v939_v4  ;;  %v977_v4 = vld [vmem:[%s1994_s4 + $0x10] sm:$0xff]  ;;  %v978_v9 = vld [vmem:[%s1994_s4 + $0x18] sm:$0xff] }
 0x355   :  { %v913_v13 = vpop.xlane.xlu1 %912 }
 0x356   :  { %v1884_v27 = vsub.f32 %v833_v62, %v917_v42  ;;  %v1886_v16 = vsub.f32 %v835_v1, %v917_v42  ;;  %v918_v5 = vmul.f32 0.001953125, %v913_v13  ;;  %v953_v12 = vadd.f32 %v952_v10, %v938_v11  ;;  %v1030_v13 = vld [vmem:[%s1993_s5 + $0x18] sm:$0xff] }
 0x357   :  { %v957_v29 = vadd.f32 %v956_v28, %v941_v15  ;;  %v1890_v22 = vsub.f32 %v886_v40, %v917_v42  ;;  %v1892_v30 = vsub.f32 %v888_v21, %v917_v42  ;;  %v1027_v40 = vld [vmem:[%s1993_s5] sm:$0xff]  ;;  %v1029_v28 = vld [vmem:[%s1993_s5 + $0x10] sm:$0xff] }
 0x358   :  { %v1894_v20 = vsub.f32 %v837_v48, %v918_v5  ;;  %v1896_v8 = vsub.f32 %v839_v25, %v918_v5  ;;  %954 = vadd.xlane.f32.xlu0 %v953_v12  ;;  %v943_v49 = vmul.f32 %v1884_v27, %v1884_v27  ;;  %v944_v54 = vmul.f32 %v1886_v16, %v1886_v16  ;;  %v1076_v15 = vld [vmem:[%s1995_s7] sm:$0xff] }
 0x359   :  { %v958_v24 = vadd.f32 %v957_v29, %v942_v19  ;;  %v945_v17 = vmul.f32 %v1890_v22, %v1890_v22  ;;  %v1904_v18 = vsub.f32 %v890_v0, %v918_v5  ;;  %v1906_v53 = vsub.f32 %v892_v46, %v918_v5 }
 0x35a   :  { %v961_v62 = vadd.f32 %v944_v54, %v943_v49  ;;  %v947_v31 = vmul.f32 %v1894_v20, %v1894_v20  ;;  %v948_v32 = vmul.f32 %v1896_v8, %v1896_v8  ;;  %v946_v1 = vmul.f32 %v1892_v30, %v1892_v30 }
 0x35b   :  { %959 = vadd.xlane.f32.xlu1 %v958_v24  ;;  %v949_v48 = vmul.f32 %v1904_v18, %v1904_v18  ;;  %v950_v36 = vmul.f32 %v1906_v53, %v1906_v53 }
 0x35c   :  { %v962_v55 = vadd.f32 %v961_v62, %v945_v17  ;;  %v966_v34 = vadd.f32 %v948_v32, %v947_v31 }
 0x35e   :  { %v963_v63 = vadd.f32 %v962_v55, %v946_v1  ;;  %v967_v25 = vadd.f32 %v966_v34, %v949_v48 }
 0x360   :  { %964 = vadd.xlane.f32.xlu0 %v963_v63  ;;  %v968_v38 = vadd.f32 %v967_v25, %v950_v36 }
 0x362   :  { %969 = vadd.xlane.f32.xlu1 %v968_v38 }
 0x373   :  { %1033 = vperm.xlu1 %1292, %v1027_v40  }
 0x376   :  { %1038 = vperm.xlu0 %1291, %v1028_v7  }
 0x3e5   :  { %v955_v6 = vpop.xlane.xlu0 %954 }
 0x3e6   :  { %v971_v21 = vmul.f32 0.001953125, %v955_v6 }
 0x3e8   :  { %v979_v41 = vadd.f32 1e-05, %v971_v21  ;;  %v960_v52 = vpop.xlane.xlu1 %959 }
 0x3e9   :  { %v972_v0 = vmul.f32 0.001953125, %v960_v52 }
 0x3ea   :  { %1295 = vrsqrt.f32 %v979_v41 }
 0x3eb   :  { %v980_v45 = vadd.f32 1e-05, %v972_v0 }
 0x3ed   :  { %1297 = vrsqrt.f32 %v980_v45  ;;  %v965_v46 = vpop.xlane.xlu0 %964 }
 0x3ee   :  { %v973_v58 = vmul.f32 0.001953125, %v965_v46 }
 0x3ef   :  { %v970_v47 = vpop.xlane.xlu1 %969 }
 0x3f0   :  { %v981_v50 = vadd.f32 1e-05, %v973_v58  ;;  %v974_v51 = vmul.f32 0.001953125, %v970_v47 }
 0x3f2   :  { %1299 = vrsqrt.f32 %v981_v50  ;;  %v982_v57 = vadd.f32 1e-05, %v974_v51 }
 0x3f3   :  { %v1034_v12 = vpop.permute.xlu1 %1033 }
 0x3f4   :  { %v1296_v44 = vpop.eup %1295  ;;  %1301 = vrsqrt.f32 %v982_v57 }
 0x3f5   :  { %v987_v35 = vmul.f32 %v1296_v44, %v975_v59  ;;  %v1039_v5 = vpop.permute.xlu0 %1038 }
 0x3f7   :  { %v1298_v33 = vpop.eup %1297  ;;  %993 = vperm.xlu0 %1291, %v987_v35  }
 0x3f8   :  { %v988_v26 = vmul.f32 %v1298_v33, %v976_v37 }
 0x3fa   :  { %998 = vperm.xlu1 %1292, %v988_v26  }
 0x3fc   :  { %v1300_v14 = vpop.eup %1299 }
 0x3fd   :  { %v989_v42 = vmul.f32 %v1300_v14, %v977_v4 }
 0x3fe   :  { %v1302_v11 = vpop.eup %1301 }
 0x3ff   :  { %1003 = vperm.xlu1 %1292, %v989_v42   ;;  %v990_v10 = vmul.f32 %v1302_v11, %v978_v9 }
 0x401   :  { %1008 = vperm.xlu0 %1291, %v990_v10   ;;  %v1303_v10 = vld [vmem:[%s1989_s0 + $0x8] sm:$0xff] }
 0x403   :  { %1043 = vperm.xlu1 %1292, %v1029_v28  }
 0x405   :  { %1048 = vperm.xlu0 %1291, %v1030_v13   ;;  %v1304_v13 = vld [vmem:[%s1989_s0 + $0x18] sm:$0xff] }
 0x407   :  { %1079 = vperm.xlu1 %1292, %v1076_v15  }
 0x476   :  { %v994_v19 = vpop.permute.xlu0 %993 }
 0x477   :  { %v1011_v29 = vmul.f32 %v994_v19, %v1854_v56  ;;  %v1012_v49 = vmul.f32 %v994_v19, %v1856_v60  ;;  %v1013_v54 = vmul.f32 %v994_v19, %v1858_v61  ;;  %v1014_v24 = vmul.f32 %v994_v19, %v1860_v23  ;;  %v1305_v19 = vld [vmem:[%s1989_s0 + $0x10] sm:$0xff] }
 0x479   :  { %v999_v17 = vpop.permute.xlu1 %998  ;;  %v1051_v55 = vadd.f32 %v1034_v12, %v1011_v29  ;;  %v1053_v48 = vadd.f32 %v1034_v12, %v1013_v54  ;;  %v1052_v34 = vadd.f32 %v1034_v12, %v1012_v49  ;;  %v1054_v63 = vadd.f32 %v1034_v12, %v1014_v24  ;;  %v1306_v49 = vld [vmem:[%s1989_s0 + $0x20] sm:$0xff] }
 0x47a   :  { %v1015_v62 = vmul.f32 %v999_v17, %v1862_v43  ;;  %v1016_v31 = vmul.f32 %v999_v17, %v1864_v2  ;;  %v1017_v32 = vmul.f32 %v999_v17, %v1870_v3  ;;  %v1018_v1 = vmul.f32 %v999_v17, %v1878_v39 }
 0x47c   :  { %v1055_v56 = vadd.f32 %v1039_v5, %v1015_v62  ;;  %v1057_v36 = vadd.f32 %v1039_v5, %v1017_v32  ;;  %v1056_v60 = vadd.f32 %v1039_v5, %v1016_v31  ;;  %v1058_v25 = vadd.f32 %v1039_v5, %v1018_v1 }
 0x47e   :  { %v1004_v61 = vpop.permute.xlu1 %1003  ;;  %v1069_v38 = vpack.c.bf16 %v1056_v60, %v1052_v34  ;;  %v1071_v23 = vpack.c.bf16 %v1058_v25, %v1054_v63  ;;  %v1068_v40 = vpack.c.bf16 %v1055_v56, %v1051_v55  ;;  %v1070_v7 = vpack.c.bf16 %v1057_v36, %v1053_v48 }
 0x47f   :  { %v1019_v2 = vmul.f32 %v1004_v61, %v1884_v27  ;;  %v1020_v3 = vmul.f32 %v1004_v61, %v1886_v16  ;;  %v1021_v39 = vmul.f32 %v1004_v61, %v1890_v22  ;;  %v1022_v6 = vmul.f32 %v1004_v61, %v1892_v30 }
 0x480   :  { %1086 = vmatprep.subr.bf16.mxu0 %v1069_v38  ;;  %1127 = vmatprep.subr.bf16.mxu1 %v1071_v23  ;;  %v1009_v43 = vpop.permute.xlu0 %1008 }
 0x481   :  { %1087 = vmatpush1.bf16.msra.mxu0 %v1068_v40  ;;  %1128 = vmatpush1.bf16.msra.mxu1 %v1070_v7  ;;  %v1023_v41 = vmul.f32 %v1009_v43, %v1894_v20  ;;  %v1024_v52 = vmul.f32 %v1009_v43, %v1896_v8  ;;  %v1025_v0 = vmul.f32 %v1009_v43, %v1904_v18  ;;  %v1067_v20 = vld [vmem:[%s1996_s6] sm:$0xf] }
 0x482   :  { %v1044_v21 = vpop.permute.xlu1 %1043  ;;  %v1026_v45 = vmul.f32 %v1009_v43, %v1906_v53 }
 0x483   :  { %v1059_v46 = vadd.f32 %v1044_v21, %v1019_v2  ;;  %v1060_v58 = vadd.f32 %v1044_v21, %v1020_v3  ;;  %v1061_v47 = vadd.f32 %v1044_v21, %v1021_v39  ;;  %v1062_v50 = vadd.f32 %v1044_v21, %v1022_v6 }
 0x484   :  { %v1049_v27 = vpop.permute.xlu0 %1048 }
 0x485   :  { %v1063_v51 = vadd.f32 %v1049_v27, %v1023_v41  ;;  %v1064_v16 = vadd.f32 %v1049_v27, %v1024_v52  ;;  %v1065_v57 = vadd.f32 %v1049_v27, %v1025_v0  ;;  %v1066_v22 = vadd.f32 %v1049_v27, %v1026_v45 }
 0x486   :  { %v1080_v8 = vpop.permute.xlu1 %1079 }
 0x487   :  { %v1072_v59 = vpack.c.bf16 %v1063_v51, %v1059_v46  ;;  %v1074_v30 = vpack.c.bf16 %v1065_v57, %v1061_v47  ;;  %v1073_v44 = vpack.c.bf16 %v1064_v16, %v1060_v58  ;;  %v1075_v35 = vpack.c.bf16 %v1066_v22, %v1062_v50 }
 0x489   :  { %1088 = vmatprep.subr.bf16.mxu0 %v1073_v44  ;;  %1129 = vmatprep.subr.bf16.mxu1 %v1075_v35 }
 0x48a   :  { %1089 = vmatpush1.bf16.msra.mxu0 %v1072_v59  ;;  %1130 = vmatpush1.bf16.msra.mxu1 %v1074_v30 }
 0x48d   :  { %1194 = vmatmul.mubr.msk.bf16.vlgmr.msra.gmra.mrb[8].mxu0 %vm1082_vm15, %v1067_v20  ;;  %1195 = vmatmul.mubr.msk.bf16.vlgmr.msra.gmra.mrb[8].mxu1 %vm1082_vm15, %v1067_v20 }
 0x560   :  { %v1120_v18 = vpop.f32.mrb[8].mxu0  ;;  %v1161_v53 = vpop.f32.mrb[8].mxu1 }
 0x561   :  { %v1121_v37 = vadd.f32 %v1120_v18, %v1080_v8  ;;  %v1162_v33 = vadd.f32 %v1161_v53, %v1080_v8  ;;  %v1122_v26 = vpop.f32.mrb[9].mxu0  ;;  %v1163_v4 = vpop.f32.mrb[9].mxu1 }
 0x562   :  { %v1123_v14 = vadd.f32 %v1122_v26, %v1080_v8  ;;  %v1164_v9 = vadd.f32 %v1163_v4, %v1080_v8  ;;  %v1124_v42 = vpop.f32.mrb[10].mxu0  ;;  %v1165_v11 = vpop.f32.mrb[10].mxu1 }
 0x563   :  { %v1168_v28 = vadd.f32 %v1303_v10, %v1121_v37  ;;  %v1170_v15 = vadd.f32 %v1304_v13, %v1162_v33  ;;  %v1125_v5 = vpop.f32.mrb[11].mxu0  ;;  %v1166_v12 = vpop.f32.mrb[11].mxu1 }
 0x564   :  { %v1169_v29 = vadd.f32 %v1305_v19, %v1123_v14  ;;  %v1171_v54 = vadd.f32 %v1306_v49, %v1164_v9 }
 0x565   :  { %1174 = vst [vmem:[%s1990_s8 + $0x8] sm:$0xff] %v1168_v28  ;;  %1176 = vst [vmem:[%s1990_s8 + $0x18] sm:$0xff] %v1170_v15 }
 0x566   :  { %1175 = vst [vmem:[%s1990_s8 + $0x10] sm:$0xff] %v1169_v29  ;;  %1177 = vst [vmem:[%s1990_s8 + $0x20] sm:$0xff] %v1171_v54 }

</bundles_post_ra>
